<compile_context>
chip_gen: v5e
topology: v5e:2x2
jax: 0.10.0
libtpu: 0.0.40
codegen_flags: <defaults>
</compile_context>

<pallas_src>
import jax
import jax.numpy as jnp
import numpy as np
from jax.experimental import pallas as pl
from jax.experimental.pallas import tpu as pltpu


_SQRT_HALF = 0.7071067811865476

# XLA's float32 rational approximation of erf: clamp to [-4,4], x*P(x^2)/Q(x^2).
_ERF_ALPHA = (0.00022905065861350646, 0.0034082910107109506,
              0.050955695062380861, 0.18520832239976145, 1.128379143519084)
_ERF_BETA = (-1.1791602954361697e-07, 2.3547966471313185e-05,
             0.0010179625278914885, 0.014070470171167667,
             0.11098505178285362, 0.49746925110067538, 1.0)


def _poly(x, coeffs):
    acc = jnp.full_like(x, coeffs[0])
    for c in coeffs[1:]:
        acc = acc * x + jnp.float32(c)
    return acc


def _erf(x):
    x = jnp.clip(x, -4.0, 4.0)
    x2 = x * x
    p = _poly(x2, _ERF_ALPHA)
    q = _poly(x2, _ERF_BETA)
    r = pl.reciprocal(q, approx=True)      # EUP slot (otherwise idle)
    r = r * (2.0 - q * r)                  # one Newton step -> ~f32 accuracy
    return (x * p) * r


def _gelu(t):
    # exact-erf GELU, written exactly as the PyTorch graph does it
    return (t * 0.5) * (_erf(t * _SQRT_HALF) + 1.0)


# ----------------------------- fused kernel ----------------------------------
def _fused_forward_kernel(p_ref, w1_ref, w2f_ref, w3f_ref, o_ref):
    f32 = jnp.float32
    lanes = p_ref.shape[-1]                # LB * 256

    # Per-256-lane-segment column index (each segment = one batch sample).
    seg = jax.lax.broadcasted_iota(jnp.int32, (1, lanes), 1) & 255
    ones196 = (seg < 196).astype(f32)      # valid length-axis cols / stage-2 bias row
    ones197 = (seg < 197).astype(f32)      # stage-3 bias row (even phase reaches col 196)

    # ---- stage 1: ConvTranspose2d(2->9,k3,s1,p2) as (16,24)@(24,L) + GELU ----
    # Patch cols >= 196 per segment are all-zero (incl. the bias-ones row), so
    # t6 is exactly 0 there (gelu(0)=0): the roll wrap-around taps stay clean.
    t6 = _gelu(jnp.dot(w1_ref[...], p_ref[...], preferred_element_type=f32))

    t6m1 = pltpu.roll(t6, 1, axis=1)           # t6[m-1]  (wrap lane is 0)
    t6p1 = pltpu.roll(t6, lanes - 1, axis=1)   # t6[m+1]  (wrap lane masked below)

    # ---- stage 2: ConvTranspose1d(9->6,k4,s2,p1), both phases in ONE dot ------
    #   rows 0-5  : t7[2m]   = W_k1@t6[m]   + W_k3@t6[m-1] + b2
    #   rows 8-13 : t7[2m+1] = W_k0@t6[m+1] + W_k2@t6[m]   + b2
    s2 = jnp.concatenate([t6, t6m1, t6p1, ones196], axis=0)          # (49, L)
    y = _gelu(jnp.dot(w2f_ref[...], s2, preferred_element_type=f32)) * ones196

    yom1 = pltpu.roll(y[8:16, :], 1, axis=1)   # t12_odd[m-1] (wrap lane is 0)

    # ---- stage 3: ConvTranspose1d(6->2,k2,s1,p0), both phases in ONE dot ------
    #   rows 0-1 : t13[2m]   = V0@ye[m] + V1@yo[m-1] + b3
    #   rows 2-3 : t13[2m+1] = V0@yo[m] + V1@ye[m]   + b3
    s3 = jnp.concatenate([y, yom1, ones197], axis=0)                 # (25, L)
    o_ref[...] = _gelu(jnp.dot(w3f_ref[...], s3, preferred_element_type=f32))


# ----------------------- one-time parameter repacking -------------------------
def pack_params(w1, b1, w2, b2, w3, b3):
    # Stage 1: ConvT2d(s1,p2) == valid correlation with the flipped kernel.
    # W1p[co, ci*9 + a*3 + b] = w1[ci, co, 2-a, 2-b]; bias folded into col 18.
    w1_mat = w1[:, :, ::-1, ::-1].transpose(1, 0, 2, 3).reshape(9, 18)
    w1p = jnp.zeros((16, 24), jnp.float32)
    w1p = w1p.at[:9, :18].set(w1_mat).at[:9, 18].set(b1)

    # Stage 2 fused weight; operand rows = [t6(16) | t6[m-1](16) | t6[m+1](16) | ones].
    taps2 = jnp.transpose(w2, (2, 1, 0))       # (4, 6, 9): [k, co, ci]
    w2f = jnp.zeros((16, 49), jnp.float32)
    w2f = w2f.at[0:6, 0:9].set(taps2[1])       # even phase: W_k1 on t6[m]
    w2f = w2f.at[0:6, 16:25].set(taps2[3])     #             W_k3 on t6[m-1]
    w2f = w2f.at[0:6, 48].set(b2)
    w2f = w2f.at[8:14, 0:9].set(taps2[2])      # odd phase:  W_k2 on t6[m]
    w2f = w2f.at[8:14, 32:41].set(taps2[0])    #             W_k0 on t6[m+1]
    w2f = w2f.at[8:14, 48].set(b2)

    # Stage 3 fused weight; operand rows = [ye(0:8) | yo(8:16) | yo[m-1](16:24) | ones].
    taps3 = jnp.transpose(w3, (2, 1, 0))       # (2, 2, 6): [k, co, ci]
    w3f = jnp.zeros((8, 25), jnp.float32)
    w3f = w3f.at[0:2, 0:6].set(taps3[0])       # even phase: V0 on ye[m]
    w3f = w3f.at[0:2, 16:22].set(taps3[1])     #             V1 on yo[m-1]
    w3f = w3f.at[0:2, 24].set(b3)
    w3f = w3f.at[2:4, 0:6].set(taps3[1])       # odd phase:  V1 on ye[m]
    w3f = w3f.at[2:4, 8:14].set(taps3[0])      #             V0 on yo[m]
    w3f = w3f.at[2:4, 24].set(b3)
    return w1p, w2f, w3f


# ------------------------- host-side layout plumbing --------------------------
def _pick_lane_batch(n):
    """Largest divisor of n that is <= 8 (and keeps grid >= 2 when n >= 4)."""
    cap = n if n <= 2 else max(1, n // 2)
    cap = min(cap, 8)
    lb = 1
    for cand in range(1, cap + 1):
        if n % cand == 0:
            lb = cand
    return lb


def _build_patches(x, lb):
    """(N,2,16,16) -> (N//lb, 24, lb*256) lane-batched im2col patches.
    Row 18 is the bias-ones row (1 on the 196 valid cols, 0 on padding)."""
    n = x.shape[0]
    cols = [x[:, :, a:a + 14, b:b + 14].reshape(n, 2, 1, 196)
            for a in range(3) for b in range(3)]
    p = jnp.concatenate(cols, axis=2).reshape(n, 18, 196)
    p = jnp.concatenate([p, jnp.ones((n, 1, 196), jnp.float32)], axis=1)
    p = jnp.pad(p, ((0, 0), (0, 5), (0, 60)))            # (N, 24, 256)
    g = n // lb
    return p.reshape(g, lb, 24, 256).transpose(0, 2, 1, 3).reshape(g, 24, lb * 256)


# ------------------------------- model forward --------------------------------
def model_forward(x, packed):
    """x: (N, 2, 16, 16) float32 (NCHW).  Returns (N, 2, 393) float32."""
    w1p, w2f, w3f = packed
    n = x.shape[0]
    lb = _pick_lane_batch(n)
    g = n // lb
    lanes = lb * 256

    # TODO(synk): PyTorch's forward raises here (ConvTranspose1d on a 4-D tensor);
    # as before we flatten H*W (14*14 -> 196) into the 1-D length axis.
    patches = _build_patches(x, lb)                       # (g, 24, lanes)

    out = pl.pallas_call(
        _fused_forward_kernel,
        out_shape=jax.ShapeDtypeStruct((g, 8, lanes), jnp.float32),
        grid=(g,),
        in_specs=[
            pl.BlockSpec((None, 24, lanes), lambda i: (i, 0, 0)),   # patches (+bias row)
            pl.BlockSpec((16, 24), lambda i: (0, 0)),               # W1 (+b1 folded)
            pl.BlockSpec((16, 49), lambda i: (0, 0)),               # fused stage-2 W (+b2)
            pl.BlockSpec((8, 25), lambda i: (0, 0)),                # fused stage-3 W (+b3)
        ],
        out_specs=pl.BlockSpec((None, 8, lanes), lambda i: (i, 0, 0)),
        compiler_params=pltpu.CompilerParams(
            dimension_semantics=("parallel",)),
    )(patches, w1p, w2f, w3f)

    # Undo lane-batching, then de-interleave the polyphase outputs.
    out = out.reshape(g, 8, lb, 256).transpose(0, 2, 1, 3).reshape(n, 8, 256)
    ze = out[:, 0:2, 0:197]                               # t13[2m],   m = 0..196
    zo = out[:, 2:4, 0:196]                               # t13[2m+1], m = 0..195
    body = jnp.stack([ze[..., :196], zo], axis=-1).reshape(n, 2, 392)
    return jnp.concatenate([body, ze[..., 196:197]], axis=-1)   # (N, 2, 393)


# ---------------------- pure-JAX reference (sanity check) ---------------------
def _reference_forward(x, w1, b1, w2, b2, w3, b3):
    gelu = lambda t: (t * 0.5) * (jax.scipy.special.erf(t * _SQRT_HALF) + 1.0)
    hi = jax.lax.Precision.HIGHEST
    n = x.shape[0]
    # ConvTranspose2d(2->9,k3,s1,p2) == valid correlation with flipped kernel.
    k1 = jnp.flip(w1, axis=(2, 3)).transpose(1, 0, 2, 3)
    t1 = jax.lax.conv_general_dilated(
        x, k1, window_strides=(1, 1), padding="VALID",
        dimension_numbers=("NCHW", "OIHW", "NCHW"),
        precision=hi) + b1[None, :, None, None]
    t6 = gelu(t1).reshape(n, 9, 196)
    # ConvTranspose1d(9->6,k4,s2,p1) == lhs_dilation=2, pad k-1-p=2, flipped kernel.
    k2 = jnp.flip(w2, axis=2).transpose(1, 0, 2)
    t7 = jax.lax.conv_general_dilated(
        t6, k2, window_strides=(1,), padding=[(2, 2)], lhs_dilation=(2,),
        dimension_numbers=("NCH", "OIH", "NCH"),
        precision=hi) + b2[None, :, None]
    t12 = gelu(t7)
    # ConvTranspose1d(6->2,k2,s1,p0) == pad k-1=1, flipped kernel.
    k3 = jnp.flip(w3, axis=2).transpose(1, 0, 2)
    t13 = jax.lax.conv_general_dilated(
        t12, k3, window_strides=(1,), padding=[(1, 1)],
        dimension_numbers=("NCH", "OIH", "NCH"),
        precision=hi) + b3[None, :, None]
    return gelu(t13)


# ------------------------------------ main -------------------------------------
if __name__ == "__main__":
    key = jax.random.PRNGKey(0)
    ks = jax.random.split(key, 7)

    # Batch of 2 at the module's implied per-sample shape (2, 16, 16).
    x1 = jax.random.normal(ks[0], (2, 2, 16, 16), dtype=jnp.float32)

    # Deterministic parameter init (shapes from __init__; PyTorch convT layout).
    w1 = 0.2 * jax.random.normal(ks[1], (2, 9, 3, 3), dtype=jnp.float32)
    b1 = 0.1 * jax.random.normal(ks[2], (9,), dtype=jnp.float32)
    w2 = 0.2 * jax.random.normal(ks[3], (9, 6, 4), dtype=jnp.float32)
    b2 = 0.1 * jax.random.normal(ks[4], (6,), dtype=jnp.float32)
    w3 = 0.2 * jax.random.normal(ks[5], (6, 2, 2), dtype=jnp.float32)
    b3 = 0.1 * jax.random.normal(ks[6], (2,), dtype=jnp.float32)

    packed = pack_params(w1, b1, w2, b2, w3, b3)   # hoisted: once, not per call
    out = jax.block_until_ready(jax.jit(model_forward)(x1, packed))

    assert out.shape == (2, 2, 393), out.shape
    assert out.dtype == jnp.float32
    assert bool(jnp.all(jnp.isfinite(out)))

    # Structural-correctness check against a pure-JAX reference (loose tolerance
    # to absorb MXU/conv precision differences; real packing/tap bugs are O(0.1+)).
    ref = jax.block_until_ready(_reference_forward(x1, w1, b1, w2, b2, w3, b3))
    np.testing.assert_allclose(np.asarray(out), np.asarray(ref), rtol=2e-2, atol=2e-2)

    print("KERNEL_OK")
</pallas_src>

<mosaic_0001>
module attributes {stable_mosaic.version = 11 : i64} {
  func.func @_fused_forward_kernel(%arg0: i32, %arg1: memref<1x24x512xf32, #tpu.memory_space<vmem>>, %arg2: memref<16x24xf32, #tpu.memory_space<vmem>>, %arg3: memref<16x49xf32, #tpu.memory_space<vmem>>, %arg4: memref<8x25xf32, #tpu.memory_space<vmem>>, %arg5: memref<1x8x512xf32, #tpu.memory_space<vmem>>) attributes {dimension_semantics = [#tpu.dimension_semantics<parallel>], iteration_bounds = array<i64: 1>, scalar_prefetch = 0 : i64, scratch_operands = 0 : i64, tpu.core_type = #tpu.core_type<tc>, window_params = [{transform_indices = @transform_0, window_bounds = array<i64: 1, 24, 512>}, {pipeline_mode = #tpu.pipeline_mode<synchronous>, transform_indices = @transform_1, window_bounds = array<i64: 16, 24>}, {pipeline_mode = #tpu.pipeline_mode<synchronous>, transform_indices = @transform_2, window_bounds = array<i64: 16, 49>}, {pipeline_mode = #tpu.pipeline_mode<synchronous>, transform_indices = @transform_3, window_bounds = array<i64: 8, 25>}, {transform_indices = @transform_4, window_bounds = array<i64: 1, 8, 512>}]} {
    %0 = tpu.iota {dimensions = array<i32: 1>} : vector<1x512xi32>
    %c255_i32 = arith.constant 255 : i32
    %1 = vector.broadcast %c255_i32 : i32 to vector<1x512xi32>
    %2 = arith.andi %0, %1 : vector<1x512xi32>
    %c196_i32 = arith.constant 196 : i32
    %3 = vector.broadcast %c196_i32 : i32 to vector<1x512xi32>
    %4 = arith.cmpi slt, %2, %3 : vector<1x512xi32>
    %5 = arith.extui %4 : vector<1x512xi1> to vector<1x512xi32>
    %6 = arith.sitofp %5 : vector<1x512xi32> to vector<1x512xf32>
    %c197_i32 = arith.constant 197 : i32
    %7 = vector.broadcast %c197_i32 : i32 to vector<1x512xi32>
    %8 = arith.cmpi slt, %2, %7 : vector<1x512xi32>
    %9 = arith.extui %8 : vector<1x512xi1> to vector<1x512xi32>
    %10 = arith.sitofp %9 : vector<1x512xi32> to vector<1x512xf32>
    %c0 = arith.constant 0 : index
    %c0_0 = arith.constant 0 : index
    %11 = vector.load %arg2[%c0, %c0_0] : memref<16x24xf32, #tpu.memory_space<vmem>>, vector<16x24xf32>
    %c0_1 = arith.constant 0 : index
    %c0_2 = arith.constant 0 : index
    %c0_3 = arith.constant 0 : index
    %12 = vector.load %arg1[%c0_1, %c0_2, %c0_3] : memref<1x24x512xf32, #tpu.memory_space<vmem>>, vector<1x24x512xf32>
    %13 = vector.shape_cast %12 : vector<1x24x512xf32> to vector<24x512xf32>
    %cst = arith.constant dense<0.000000e+00> : vector<16x512xf32>
    %14 = tpu.matmul %11, %13, %cst {dimension_numbers = #tpu.dot_dimension_numbers<[1], [0], [0], [1], [0, 0, 1, 1], [], []>} : vector<16x24xf32>, vector<24x512xf32>, vector<16x512xf32> -> vector<16x512xf32>
    %cst_4 = arith.constant 5.000000e-01 : f32
    %15 = vector.broadcast %cst_4 : f32 to vector<16x512xf32>
    %16 = arith.mulf %14, %15 : vector<16x512xf32>
    %cst_5 = arith.constant 0.707106769 : f32
    %17 = vector.broadcast %cst_5 : f32 to vector<16x512xf32>
    %18 = arith.mulf %14, %17 : vector<16x512xf32>
    %cst_6 = arith.constant -4.000000e+00 : f32
    %cst_7 = arith.constant 4.000000e+00 : f32
    %19 = vector.broadcast %cst_6 : f32 to vector<16x512xf32>
    %20 = arith.maximumf %19, %18 : vector<16x512xf32>
    %21 = vector.broadcast %cst_7 : f32 to vector<16x512xf32>
    %22 = arith.minimumf %21, %20 : vector<16x512xf32>
    %23 = arith.mulf %22, %22 : vector<16x512xf32>
    %cst_8 = arith.constant 2.29050653E-4 : f32
    %24 = vector.broadcast %cst_8 : f32 to vector<16x512xf32>
    %25 = arith.mulf %24, %23 : vector<16x512xf32>
    %cst_9 = arith.constant 0.00340829091 : f32
    %26 = vector.broadcast %cst_9 : f32 to vector<16x512xf32>
    %27 = arith.addf %25, %26 : vector<16x512xf32>
    %28 = arith.mulf %27, %23 : vector<16x512xf32>
    %cst_10 = arith.constant 0.0509556942 : f32
    %29 = vector.broadcast %cst_10 : f32 to vector<16x512xf32>
    %30 = arith.addf %28, %29 : vector<16x512xf32>
    %31 = arith.mulf %30, %23 : vector<16x512xf32>
    %cst_11 = arith.constant 0.185208321 : f32
    %32 = vector.broadcast %cst_11 : f32 to vector<16x512xf32>
    %33 = arith.addf %31, %32 : vector<16x512xf32>
    %34 = arith.mulf %33, %23 : vector<16x512xf32>
    %cst_12 = arith.constant 1.12837911 : f32
    %35 = vector.broadcast %cst_12 : f32 to vector<16x512xf32>
    %36 = arith.addf %34, %35 : vector<16x512xf32>
    %cst_13 = arith.constant -1.17916031E-7 : f32
    %37 = vector.broadcast %cst_13 : f32 to vector<16x512xf32>
    %38 = arith.mulf %37, %23 : vector<16x512xf32>
    %cst_14 = arith.constant 2.35479656E-5 : f32
    %39 = vector.broadcast %cst_14 : f32 to vector<16x512xf32>
    %40 = arith.addf %38, %39 : vector<16x512xf32>
    %41 = arith.mulf %40, %23 : vector<16x512xf32>
    %cst_15 = arith.constant 0.00101796258 : f32
    %42 = vector.broadcast %cst_15 : f32 to vector<16x512xf32>
    %43 = arith.addf %41, %42 : vector<16x512xf32>
    %44 = arith.mulf %43, %23 : vector<16x512xf32>
    %cst_16 = arith.constant 0.0140704699 : f32
    %45 = vector.broadcast %cst_16 : f32 to vector<16x512xf32>
    %46 = arith.addf %44, %45 : vector<16x512xf32>
    %47 = arith.mulf %46, %23 : vector<16x512xf32>
    %cst_17 = arith.constant 0.110985048 : f32
    %48 = vector.broadcast %cst_17 : f32 to vector<16x512xf32>
    %49 = arith.addf %47, %48 : vector<16x512xf32>
    %50 = arith.mulf %49, %23 : vector<16x512xf32>
    %cst_18 = arith.constant 0.497469246 : f32
    %51 = vector.broadcast %cst_18 : f32 to vector<16x512xf32>
    %52 = arith.addf %50, %51 : vector<16x512xf32>
    %53 = arith.mulf %52, %23 : vector<16x512xf32>
    %cst_19 = arith.constant 1.000000e+00 : f32
    %54 = vector.broadcast %cst_19 : f32 to vector<16x512xf32>
    %55 = arith.addf %53, %54 : vector<16x512xf32>
    %56 = tpu.reciprocal %55 {approx = true} : vector<16x512xf32> -> vector<16x512xf32>
    %57 = arith.mulf %55, %56 : vector<16x512xf32>
    %cst_20 = arith.constant 2.000000e+00 : f32
    %58 = vector.broadcast %cst_20 : f32 to vector<16x512xf32>
    %59 = arith.subf %58, %57 : vector<16x512xf32>
    %60 = arith.mulf %56, %59 : vector<16x512xf32>
    %61 = arith.mulf %22, %36 : vector<16x512xf32>
    %62 = arith.mulf %61, %60 : vector<16x512xf32>
    %cst_21 = arith.constant 1.000000e+00 : f32
    %63 = vector.broadcast %cst_21 : f32 to vector<16x512xf32>
    %64 = arith.addf %62, %63 : vector<16x512xf32>
    %65 = arith.mulf %16, %64 : vector<16x512xf32>
    %c1_i32 = arith.constant 1 : i32
    %66 = tpu.dynamic_rotate %65 by %c1_i32 dim 1 : vector<16x512xf32>, i32 -> vector<16x512xf32>
    %c511_i32 = arith.constant 511 : i32
    %67 = tpu.dynamic_rotate %65 by %c511_i32 dim 1 : vector<16x512xf32>, i32 -> vector<16x512xf32>
    %68 = tpu.concatenate %65, %66, %67, %6 in 0 : vector<16x512xf32>, vector<16x512xf32>, vector<16x512xf32>, vector<1x512xf32> -> vector<49x512xf32>
    %c0_22 = arith.constant 0 : index
    %c0_23 = arith.constant 0 : index
    %69 = vector.load %arg3[%c0_22, %c0_23] : memref<16x49xf32, #tpu.memory_space<vmem>>, vector<16x49xf32>
    %cst_24 = arith.constant dense<0.000000e+00> : vector<16x512xf32>
    %70 = tpu.matmul %69, %68, %cst_24 {dimension_numbers = #tpu.dot_dimension_numbers<[1], [0], [0], [1], [0, 0, 1, 1], [], []>} : vector<16x49xf32>, vector<49x512xf32>, vector<16x512xf32> -> vector<16x512xf32>
    %cst_25 = arith.constant 5.000000e-01 : f32
    %71 = vector.broadcast %cst_25 : f32 to vector<16x512xf32>
    %72 = arith.mulf %70, %71 : vector<16x512xf32>
    %cst_26 = arith.constant 0.707106769 : f32
    %73 = vector.broadcast %cst_26 : f32 to vector<16x512xf32>
    %74 = arith.mulf %70, %73 : vector<16x512xf32>
    %cst_27 = arith.constant -4.000000e+00 : f32
    %cst_28 = arith.constant 4.000000e+00 : f32
    %75 = vector.broadcast %cst_27 : f32 to vector<16x512xf32>
    %76 = arith.maximumf %75, %74 : vector<16x512xf32>
    %77 = vector.broadcast %cst_28 : f32 to vector<16x512xf32>
    %78 = arith.minimumf %77, %76 : vector<16x512xf32>
    %79 = arith.mulf %78, %78 : vector<16x512xf32>
    %cst_29 = arith.constant 2.29050653E-4 : f32
    %80 = vector.broadcast %cst_29 : f32 to vector<16x512xf32>
    %81 = arith.mulf %80, %79 : vector<16x512xf32>
    %cst_30 = arith.constant 0.00340829091 : f32
    %82 = vector.broadcast %cst_30 : f32 to vector<16x512xf32>
    %83 = arith.addf %81, %82 : vector<16x512xf32>
    %84 = arith.mulf %83, %79 : vector<16x512xf32>
    %cst_31 = arith.constant 0.0509556942 : f32
    %85 = vector.broadcast %cst_31 : f32 to vector<16x512xf32>
    %86 = arith.addf %84, %85 : vector<16x512xf32>
    %87 = arith.mulf %86, %79 : vector<16x512xf32>
    %cst_32 = arith.constant 0.185208321 : f32
    %88 = vector.broadcast %cst_32 : f32 to vector<16x512xf32>
    %89 = arith.addf %87, %88 : vector<16x512xf32>
    %90 = arith.mulf %89, %79 : vector<16x512xf32>
    %cst_33 = arith.constant 1.12837911 : f32
    %91 = vector.broadcast %cst_33 : f32 to vector<16x512xf32>
    %92 = arith.addf %90, %91 : vector<16x512xf32>
    %cst_34 = arith.constant -1.17916031E-7 : f32
    %93 = vector.broadcast %cst_34 : f32 to vector<16x512xf32>
    %94 = arith.mulf %93, %79 : vector<16x512xf32>
    %cst_35 = arith.constant 2.35479656E-5 : f32
    %95 = vector.broadcast %cst_35 : f32 to vector<16x512xf32>
    %96 = arith.addf %94, %95 : vector<16x512xf32>
    %97 = arith.mulf %96, %79 : vector<16x512xf32>
    %cst_36 = arith.constant 0.00101796258 : f32
    %98 = vector.broadcast %cst_36 : f32 to vector<16x512xf32>
    %99 = arith.addf %97, %98 : vector<16x512xf32>
    %100 = arith.mulf %99, %79 : vector<16x512xf32>
    %cst_37 = arith.constant 0.0140704699 : f32
    %101 = vector.broadcast %cst_37 : f32 to vector<16x512xf32>
    %102 = arith.addf %100, %101 : vector<16x512xf32>
    %103 = arith.mulf %102, %79 : vector<16x512xf32>
    %cst_38 = arith.constant 0.110985048 : f32
    %104 = vector.broadcast %cst_38 : f32 to vector<16x512xf32>
    %105 = arith.addf %103, %104 : vector<16x512xf32>
    %106 = arith.mulf %105, %79 : vector<16x512xf32>
    %cst_39 = arith.constant 0.497469246 : f32
    %107 = vector.broadcast %cst_39 : f32 to vector<16x512xf32>
    %108 = arith.addf %106, %107 : vector<16x512xf32>
    %109 = arith.mulf %108, %79 : vector<16x512xf32>
    %cst_40 = arith.constant 1.000000e+00 : f32
    %110 = vector.broadcast %cst_40 : f32 to vector<16x512xf32>
    %111 = arith.addf %109, %110 : vector<16x512xf32>
    %112 = tpu.reciprocal %111 {approx = true} : vector<16x512xf32> -> vector<16x512xf32>
    %113 = arith.mulf %111, %112 : vector<16x512xf32>
    %cst_41 = arith.constant 2.000000e+00 : f32
    %114 = vector.broadcast %cst_41 : f32 to vector<16x512xf32>
    %115 = arith.subf %114, %113 : vector<16x512xf32>
    %116 = arith.mulf %112, %115 : vector<16x512xf32>
    %117 = arith.mulf %78, %92 : vector<16x512xf32>
    %118 = arith.mulf %117, %116 : vector<16x512xf32>
    %cst_42 = arith.constant 1.000000e+00 : f32
    %119 = vector.broadcast %cst_42 : f32 to vector<16x512xf32>
    %120 = arith.addf %118, %119 : vector<16x512xf32>
    %121 = arith.mulf %72, %120 : vector<16x512xf32>
    %122 = vector.broadcast %6 : vector<1x512xf32> to vector<16x512xf32>
    %123 = arith.mulf %121, %122 : vector<16x512xf32>
    %124 = vector.extract_strided_slice %123 {offsets = [8, 0], sizes = [8, 512], strides = [1, 1]} : vector<16x512xf32> to vector<8x512xf32>
    %c1_i32_43 = arith.constant 1 : i32
    %125 = tpu.dynamic_rotate %124 by %c1_i32_43 dim 1 : vector<8x512xf32>, i32 -> vector<8x512xf32>
    %126 = tpu.concatenate %123, %125, %10 in 0 : vector<16x512xf32>, vector<8x512xf32>, vector<1x512xf32> -> vector<25x512xf32>
    %c0_44 = arith.constant 0 : index
    %c0_45 = arith.constant 0 : index
    %127 = vector.load %arg4[%c0_44, %c0_45] : memref<8x25xf32, #tpu.memory_space<vmem>>, vector<8x25xf32>
    %cst_46 = arith.constant dense<0.000000e+00> : vector<8x512xf32>
    %128 = tpu.matmul %127, %126, %cst_46 {dimension_numbers = #tpu.dot_dimension_numbers<[1], [0], [0], [1], [0, 0, 1, 1], [], []>} : vector<8x25xf32>, vector<25x512xf32>, vector<8x512xf32> -> vector<8x512xf32>
    %cst_47 = arith.constant 5.000000e-01 : f32
    %129 = vector.broadcast %cst_47 : f32 to vector<8x512xf32>
    %130 = arith.mulf %128, %129 : vector<8x512xf32>
    %cst_48 = arith.constant 0.707106769 : f32
    %131 = vector.broadcast %cst_48 : f32 to vector<8x512xf32>
    %132 = arith.mulf %128, %131 : vector<8x512xf32>
    %cst_49 = arith.constant -4.000000e+00 : f32
    %cst_50 = arith.constant 4.000000e+00 : f32
    %133 = vector.broadcast %cst_49 : f32 to vector<8x512xf32>
    %134 = arith.maximumf %133, %132 : vector<8x512xf32>
    %135 = vector.broadcast %cst_50 : f32 to vector<8x512xf32>
    %136 = arith.minimumf %135, %134 : vector<8x512xf32>
    %137 = arith.mulf %136, %136 : vector<8x512xf32>
    %cst_51 = arith.constant 2.29050653E-4 : f32
    %138 = vector.broadcast %cst_51 : f32 to vector<8x512xf32>
    %139 = arith.mulf %138, %137 : vector<8x512xf32>
    %cst_52 = arith.constant 0.00340829091 : f32
    %140 = vector.broadcast %cst_52 : f32 to vector<8x512xf32>
    %141 = arith.addf %139, %140 : vector<8x512xf32>
    %142 = arith.mulf %141, %137 : vector<8x512xf32>
    %cst_53 = arith.constant 0.0509556942 : f32
    %143 = vector.broadcast %cst_53 : f32 to vector<8x512xf32>
    %144 = arith.addf %142, %143 : vector<8x512xf32>
    %145 = arith.mulf %144, %137 : vector<8x512xf32>
    %cst_54 = arith.constant 0.185208321 : f32
    %146 = vector.broadcast %cst_54 : f32 to vector<8x512xf32>
    %147 = arith.addf %145, %146 : vector<8x512xf32>
    %148 = arith.mulf %147, %137 : vector<8x512xf32>
    %cst_55 = arith.constant 1.12837911 : f32
    %149 = vector.broadcast %cst_55 : f32 to vector<8x512xf32>
    %150 = arith.addf %148, %149 : vector<8x512xf32>
    %cst_56 = arith.constant -1.17916031E-7 : f32
    %151 = vector.broadcast %cst_56 : f32 to vector<8x512xf32>
    %152 = arith.mulf %151, %137 : vector<8x512xf32>
    %cst_57 = arith.constant 2.35479656E-5 : f32
    %153 = vector.broadcast %cst_57 : f32 to vector<8x512xf32>
    %154 = arith.addf %152, %153 : vector<8x512xf32>
    %155 = arith.mulf %154, %137 : vector<8x512xf32>
    %cst_58 = arith.constant 0.00101796258 : f32
    %156 = vector.broadcast %cst_58 : f32 to vector<8x512xf32>
    %157 = arith.addf %155, %156 : vector<8x512xf32>
    %158 = arith.mulf %157, %137 : vector<8x512xf32>
    %cst_59 = arith.constant 0.0140704699 : f32
    %159 = vector.broadcast %cst_59 : f32 to vector<8x512xf32>
    %160 = arith.addf %158, %159 : vector<8x512xf32>
    %161 = arith.mulf %160, %137 : vector<8x512xf32>
    %cst_60 = arith.constant 0.110985048 : f32
    %162 = vector.broadcast %cst_60 : f32 to vector<8x512xf32>
    %163 = arith.addf %161, %162 : vector<8x512xf32>
    %164 = arith.mulf %163, %137 : vector<8x512xf32>
    %cst_61 = arith.constant 0.497469246 : f32
    %165 = vector.broadcast %cst_61 : f32 to vector<8x512xf32>
    %166 = arith.addf %164, %165 : vector<8x512xf32>
    %167 = arith.mulf %166, %137 : vector<8x512xf32>
    %cst_62 = arith.constant 1.000000e+00 : f32
    %168 = vector.broadcast %cst_62 : f32 to vector<8x512xf32>
    %169 = arith.addf %167, %168 : vector<8x512xf32>
    %170 = tpu.reciprocal %169 {approx = true} : vector<8x512xf32> -> vector<8x512xf32>
    %171 = arith.mulf %169, %170 : vector<8x512xf32>
    %cst_63 = arith.constant 2.000000e+00 : f32
    %172 = vector.broadcast %cst_63 : f32 to vector<8x512xf32>
    %173 = arith.subf %172, %171 : vector<8x512xf32>
    %174 = arith.mulf %170, %173 : vector<8x512xf32>
    %175 = arith.mulf %136, %150 : vector<8x512xf32>
    %176 = arith.mulf %175, %174 : vector<8x512xf32>
    %cst_64 = arith.constant 1.000000e+00 : f32
    %177 = vector.broadcast %cst_64 : f32 to vector<8x512xf32>
    %178 = arith.addf %176, %177 : vector<8x512xf32>
    %179 = arith.mulf %130, %178 : vector<8x512xf32>
    %c0_65 = arith.constant 0 : index
    %c0_66 = arith.constant 0 : index
    %c0_67 = arith.constant 0 : index
    %180 = vector.load %arg5[%c0_65, %c0_66, %c0_67] : memref<1x8x512xf32, #tpu.memory_space<vmem>>, vector<1x8x512xf32>
    %181 = vector.shape_cast %180 : vector<1x8x512xf32> to vector<8x512xf32>
    %182 = vector.shape_cast %179 : vector<8x512xf32> to vector<1x8x512xf32>
    tpu.vector_store %arg5[%c0_65, %c0_66, %c0_67], %182 {strides = array<i32>} : memref<1x8x512xf32, #tpu.memory_space<vmem>>, vector<1x8x512xf32>,
    return
  }
  func.func @transform_0(%arg0: i32) -> (i32, i32, i32) {
    %c0_i32 = arith.constant 0 : i32
    %c0_i32_0 = arith.constant 0 : i32
    %c0_i32_1 = arith.constant 0 : i32
    return %arg0, %c0_i32, %c0_i32_0 : i32, i32, i32
  }
  func.func @transform_1(%arg0: i32) -> (i32, i32) {
    %c0_i32 = arith.constant 0 : i32
    %c0_i32_0 = arith.constant 0 : i32
    %c0_i32_1 = arith.constant 0 : i32
    return %c0_i32, %c0_i32_0 : i32, i32
  }
  func.func @transform_2(%arg0: i32) -> (i32, i32) {
    %c0_i32 = arith.constant 0 : i32
    %c0_i32_0 = arith.constant 0 : i32
    %c0_i32_1 = arith.constant 0 : i32
    return %c0_i32, %c0_i32_0 : i32, i32
  }
  func.func @transform_3(%arg0: i32) -> (i32, i32) {
    %c0_i32 = arith.constant 0 : i32
    %c0_i32_0 = arith.constant 0 : i32
    %c0_i32_1 = arith.constant 0 : i32
    return %c0_i32, %c0_i32_0 : i32, i32
  }
  func.func @transform_4(%arg0: i32) -> (i32, i32, i32) {
    %c0_i32 = arith.constant 0 : i32
    %c0_i32_0 = arith.constant 0 : i32
    %c0_i32_1 = arith.constant 0 : i32
    return %arg0, %c0_i32, %c0_i32_0 : i32, i32, i32
  }
}

</mosaic_0001>

<bundles_post_ra>
// kernel: model_forward.1
= control target key start
LH: loop header
LB: loop body
LE: loop exit
PB: predicated region body
PF: predicated region fallthrough
CT: control target
= control target key end

     0   :  { %vm64_vm0 = vcmask 195584   ;;  %vm486_vm2 = vcmask 1040384   ;;  %vm479_vm6 = vcmask 400384   ;;  %vm876_vm9 = vcmask 203776   ;;  %s1921_s0 = inlined_call_operand.vmem [shape: f32[1,24,512], index: 0, kind: input, shape index: {}]   ;;  %s1922_s1 = inlined_call_operand.vmem [shape: f32[16,24], index: 1, kind: input, shape index: {}]   ;;  %s1923_s2 = inlined_call_operand.vmem [shape: f32[16,49], index: 2, kind: input, shape index: {}]   ;;  %s1924_s3 = inlined_call_operand.vmem [shape: f32[8,25], index: 3, kind: input, shape index: {}]   ;;  %s1925_s4 = inlined_call_operand.vmem [shape: f32[1,8,512], index: 4, kind: output, shape index: {}]  }
   0x1   :  { %v60_v0 = vld [vmem:[%s1921_s0 + $0x40] sm:$0xff]  ;;  %v61_v1 = vld [vmem:[%s1921_s0 + $0x48] sm:$0xff]  ;;  %v62_v2 = vld [vmem:[%s1921_s0 + $0x50] sm:$0xff] }
   0x2   :  { %84 = vmatpush.msra.mxu0 %v60_v0  ;;  %107 = vmatpush.msra.mxu1 %v61_v1  ;;  %v63_v3 = vld [vmem:[%s1921_s0 + $0x58] sm:$0xff]  ;;  %v56_v4 = vld [vmem:[%s1921_s0 + $0x20] sm:$0xff]  ;;  %v57_v5 = vld [vmem:[%s1921_s0 + $0x28] sm:$0xff] }
   0x3   :  { %130 = vmatpush.msra.mxu2 %v62_v2  ;;  %153 = vmatpush.msra.mxu3 %v63_v3  ;;  %v58_v6 = vld [vmem:[%s1921_s0 + $0x30] sm:$0xff]  ;;  %v59_v7 = vld [vmem:[%s1921_s0 + $0x38] sm:$0xff]  ;;  %v52_v8 = vld [vmem:[%s1921_s0] sm:$0xff] }
   0x4   :  { %85 = vmatpush.msra.mxu0 %v56_v4  ;;  %108 = vmatpush.msra.mxu1 %v57_v5  ;;  %v53_v9 = vld [vmem:[%s1921_s0 + $0x8] sm:$0xff]  ;;  %v54_v10 = vld [vmem:[%s1921_s0 + $0x10] sm:$0xff]  ;;  %v55_v11 = vld [vmem:[%s1921_s0 + $0x18] sm:$0xff]  ;;  %s1253_s0 = smov 127  }
   0x5   :  { %131 = vmatpush.msra.mxu2 %v58_v6  ;;  %154 = vmatpush.msra.mxu3 %v59_v7  ;;  %v50_v12 = vld [vmem:[%s1922_s1] sm:$0xff]  ;;  %v51_v13 = vld [vmem:[%s1922_s1 + $0x8] sm:$0xff]  ;;  %s1254_s1 = smov 1  }
   0x6   :  { %86 = vmatpush.msra.mxu0 %v52_v8  ;;  %109 = vmatpush.msra.mxu1 %v53_v9 }
   0x7   :  { %132 = vmatpush.msra.mxu2 %v54_v10  ;;  %155 = vmatpush.msra.mxu3 %v55_v11 }
   0x8   :  { %1116 = vmatmul.msk.f32.vlgmr.msra.gmra.mxu0 %vm64_vm0, %v50_v12  ;;  %1118 = vmatmul.msk.f32.vlgmr.msra.gmra.mxu1 %vm64_vm0, %v50_v12 }
   0x9   :  { %1120 = vmatmul.msk.f32.vlgmr.msra.gmra.mxu2 %vm64_vm0, %v50_v12  ;;  %1122 = vmatmul.msk.f32.vlgmr.msra.gmra.mxu3 %vm64_vm0, %v50_v12 }
  0x10   :  { %1117 = vmatmul.msk.f32.gmra.mxu0 %vm64_vm0, %v51_v13  ;;  %1119 = vmatmul.msk.f32.gmra.mxu1 %vm64_vm0, %v51_v13 }
  0x11   :  { %1121 = vmatmul.msk.f32.gmra.mxu2 %vm64_vm0, %v51_v13  ;;  %1123 = vmatmul.msk.f32.gmra.mxu3 %vm64_vm0, %v51_v13 }
  0x85   :  { %v1324_v14 = vpop.f32.mrf.mxu0  ;;  %v1326_v15 = vpop.f32.mrf.mxu1 }
  0x86   :  { %v172_v16 = vmul.f32 0.70710677, %v1326_v15  ;;  %v171_v21 = vmul.f32 0.70710677, %v1324_v14 }
  0x88   :  { %v1329_v17 = vclamps-f32 %v172_v16, 4.0  ;;  %v1347_v27 = vclamps-f32 %v171_v21, 4.0 }
  0x8a   :  { %v1333_v18 = vmul.f32 %v1329_v17, %v1329_v17  ;;  %v1363_v34 = vmul.f32 %v1347_v27, %v1347_v27 }
  0x8c   :  { %v1335_v19 = vpop.f32.mrf.mxu2  ;;  %v1337_v20 = vpop.f32.mrf.mxu3  ;;  %v268_v22 = vmul.f32 -1.1791603e-07, %v1333_v18  ;;  %v267_v41 = vmul.f32 -1.1791603e-07, %v1363_v34 }
  0x8d   :  { %v173_v23 = vmul.f32 0.70710677, %v1335_v19  ;;  %v174_v25 = vmul.f32 0.70710677, %v1337_v20  ;;  %v1345_v26 = vpop.f32.mrf.mxu0  ;;  %v1383_v56 = vpop.f32.mrf.mxu1 }
  0x8e   :  { %v276_v28 = vadd.f32 2.3547966e-05, %v268_v22  ;;  %v175_v31 = vmul.f32 0.70710677, %v1345_v26  ;;  %v275_v49 = vadd.f32 2.3547966e-05, %v267_v41 }
  0x8f   :  { %v1342_v24 = vclamps-f32 %v173_v23, 4.0  ;;  %v1353_v30 = vclamps-f32 %v174_v25, 4.0  ;;  %v176_v1 = vmul.f32 0.70710677, %v1383_v56  ;;  %v204_v23 = vmul.f32 0.00022905065, %v1333_v18 }
  0x90   :  { %v284_v35 = vmul.f32 %v276_v28, %v1333_v18  ;;  %v1366_v37 = vclamps-f32 %v175_v31, 4.0  ;;  %v283_v60 = vmul.f32 %v275_v49, %v1363_v34 }
  0x91   :  { %v1351_v29 = vmul.f32 %v1342_v24, %v1342_v24  ;;  %v1359_v33 = vmul.f32 %v1353_v30, %v1353_v30  ;;  %v1396_v13 = vclamps-f32 %v176_v1, 4.0 }
  0x92   :  { %v292_v42 = vadd.f32 0.0010179626, %v284_v35  ;;  %v1374_v44 = vmul.f32 %v1366_v37, %v1366_v37  ;;  %v291_v8 = vadd.f32 0.0010179626, %v283_v60 }
  0x93   :  { %v269_v32 = vmul.f32 -1.1791603e-07, %v1351_v29  ;;  %v205_v38 = vmul.f32 0.00022905065, %v1351_v29  ;;  %v270_v40 = vmul.f32 -1.1791603e-07, %v1359_v33  ;;  %v1404_v31 = vmul.f32 %v1396_v13, %v1396_v13 }
  0x94   :  { %v206_v47 = vmul.f32 0.00022905065, %v1359_v33  ;;  %v300_v50 = vmul.f32 %v292_v42, %v1333_v18  ;;  %v271_v53 = vmul.f32 -1.1791603e-07, %v1374_v44  ;;  %v1391_v7 = vpop.f32.mrf.mxu2 }
  0x95   :  { %v277_v36 = vadd.f32 2.3547966e-05, %v269_v32  ;;  %v213_v45 = vadd.f32 0.003408291, %v205_v38  ;;  %v278_v48 = vadd.f32 2.3547966e-05, %v270_v40  ;;  %v299_v32 = vmul.f32 %v291_v8, %v1363_v34 }
  0x96   :  { %v214_v57 = vadd.f32 0.003408291, %v206_v47  ;;  %v279_v59 = vadd.f32 2.3547966e-05, %v271_v53  ;;  %v308_v61 = vadd.f32 0.01407047, %v300_v50 }
  0x97   :  { %v285_v39 = vmul.f32 %v277_v36, %v1351_v29  ;;  %v286_v52 = vmul.f32 %v278_v48, %v1359_v33  ;;  %v221_v54 = vmul.f32 %v213_v45, %v1351_v29  ;;  %v177_v22 = vmul.f32 0.70710677, %v1391_v7  ;;  %v1416_v48 = vpop.f32.mrf.mxu3 }
  0x98   :  { %v287_v0 = vmul.f32 %v279_v59, %v1374_v44  ;;  %v222_v4 = vmul.f32 %v214_v57, %v1359_v33  ;;  %v316_v9 = vmul.f32 %v308_v61, %v1333_v18  ;;  %v272_v42 = vmul.f32 -1.1791603e-07, %v1404_v31 }
  0x99   :  { %v293_v43 = vadd.f32 0.0010179626, %v285_v39  ;;  %v294_v58 = vadd.f32 0.0010179626, %v286_v52  ;;  %v229_v2 = vadd.f32 0.050955694, %v221_v54 }
  0x9a   :  { %v295_v6 = vadd.f32 0.0010179626, %v287_v0  ;;  %v230_v25 = vadd.f32 0.050955694, %v222_v4  ;;  %v324_v35 = vadd.f32 0.11098505, %v316_v9 }
  0x9b   :  { %v301_v46 = vmul.f32 %v293_v43, %v1351_v29  ;;  %v302_v63 = vmul.f32 %v294_v58, %v1359_v33  ;;  %v237_v16 = vmul.f32 %v229_v2, %v1351_v29  ;;  %v1407_v38 = vclamps-f32 %v177_v22, 4.0 }
  0x9c   :  { %v303_v12 = vmul.f32 %v295_v6, %v1374_v44  ;;  %v212_v43 = vadd.f32 0.003408291, %v204_v23  ;;  %v238_v45 = vmul.f32 %v230_v25, %v1359_v33  ;;  %v307_v49 = vadd.f32 0.01407047, %v299_v32 }
  0x9d   :  { %v309_v51 = vadd.f32 0.01407047, %v301_v46  ;;  %v310_v5 = vadd.f32 0.01407047, %v302_v63  ;;  %v245_v41 = vadd.f32 0.18520832, %v237_v16  ;;  %v1414_v47 = vmul.f32 %v1407_v38, %v1407_v38 }
  0x9e   :  { %v311_v40 = vadd.f32 0.01407047, %v303_v12  ;;  %v332_v50 = vmul.f32 %v324_v35, %v1333_v18  ;;  %v208_v54 = vmul.f32 0.00022905065, %v1404_v31  ;;  %v178_v58 = vmul.f32 0.70710677, %v1416_v48 }
  0x9f   :  { %v317_v55 = vmul.f32 %v309_v51, %v1351_v29  ;;  %v318_v11 = vmul.f32 %v310_v5, %v1359_v33  ;;  %v280_v51 = vadd.f32 2.3547966e-05, %v272_v42  ;;  %v220_v59 = vmul.f32 %v212_v43, %v1333_v18 }
  0xa0   :  { %v319_v53 = vmul.f32 %v311_v40, %v1374_v44  ;;  %v246_v60 = vadd.f32 0.18520832, %v238_v45  ;;  %v1428_v0 = vmul.f32 0.00022905065, %v1363_v34  ;;  %v315_v1 = vmul.f32 %v307_v49, %v1363_v34 }
  0xa1   :  { %v325_v62 = vadd.f32 0.11098505, %v317_v55  ;;  %v326_v28 = vadd.f32 0.11098505, %v318_v11  ;;  %v253_v55 = vmul.f32 %v245_v41, %v1351_v29  ;;  %v288_v57 = vmul.f32 %v280_v51, %v1404_v31 }
  0xa2   :  { %v340_v2 = vadd.f32 0.49746925, %v332_v50  ;;  %v216_v5 = vadd.f32 0.003408291, %v208_v54  ;;  %v165_v6 = vmul.f32 0.5, %v1335_v19  ;;  %v254_v16 = vmul.f32 %v246_v60, %v1359_v33 }
  0xa3   :  { %v333_v3 = vmul.f32 %v325_v62, %v1351_v29  ;;  %v334_v39 = vmul.f32 %v326_v28, %v1359_v33  ;;  %v273_v62 = vmul.f32 -1.1791603e-07, %v1414_v47  ;;  %v261_v8 = vadd.f32 1.1283791, %v253_v55 }
  0xa4   :  { %v228_v11 = vadd.f32 0.050955694, %v220_v59  ;;  %v323_v22 = vadd.f32 0.11098505, %v315_v1  ;;  %v348_v23 = vmul.f32 %v340_v2, %v1333_v18  ;;  %v166_v25 = vmul.f32 0.5, %v1337_v20 }
  0xa5   :  { %v341_v10 = vadd.f32 0.49746925, %v333_v3  ;;  %v342_v46 = vadd.f32 0.49746925, %v334_v39  ;;  %v296_v3 = vadd.f32 0.0010179626, %v288_v57  ;;  %v224_v19 = vmul.f32 %v216_v5, %v1404_v31 }
  0xa6   :  { %v397_v39 = vmul.f32 %v1342_v24, %v261_v8  ;;  %v236_v20 = vmul.f32 %v228_v11, %v1333_v18  ;;  %v262_v43 = vadd.f32 1.1283791, %v254_v16  ;;  %v207_v45 = vmul.f32 0.00022905065, %v1374_v44 }
  0xa7   :  { %v349_v21 = vmul.f32 %v341_v10, %v1351_v29  ;;  %v350_v52 = vmul.f32 %v342_v46, %v1359_v33  ;;  %v327_v29 = vadd.f32 0.11098505, %v319_v53  ;;  %v304_v9 = vmul.f32 %v296_v3, %v1404_v31 }
  0xa8   :  { %v1433_v10 = vclamps-f32 %v178_v58, 4.0  ;;  %v209_v33 = vmul.f32 0.00022905065, %v1414_v47  ;;  %v331_v49 = vmul.f32 %v323_v22, %v1363_v34  ;;  %v232_v53 = vadd.f32 0.050955694, %v224_v19 }
  0xa9   :  { %v357_v36 = vadd.f32 1.0, %v349_v21  ;;  %v358_v61 = vadd.f32 1.0, %v350_v52  ;;  %v281_v21 = vadd.f32 2.3547966e-05, %v273_v62  ;;  %v312_v28 = vadd.f32 0.01407047, %v304_v9 }
  0xaa   :  { %v335_v35 = vmul.f32 %v327_v29, %v1374_v44  ;;  %v1446_v41 = vmul.f32 %v1433_v10, %v1433_v10  ;;  %v356_v57 = vadd.f32 1.0, %v348_v23  ;;  %v217_v60 = vadd.f32 0.003408291, %v209_v33 }
  0xab   :  { %1213 = vrcp.f32 %v357_v36  ;;  %v320_v40 = vmul.f32 %v312_v28, %v1404_v31  ;;  %v398_v62 = vmul.f32 %v1353_v30, %v262_v43  ;;  %v240_v8 = vmul.f32 %v232_v53, %v1404_v31 }
  0xac   :  { %1215 = vrcp.f32 %v358_v61  ;;  %v343_v52 = vadd.f32 0.49746925, %v335_v35  ;;  %v274_v55 = vmul.f32 -1.1791603e-07, %v1446_v41  ;;  %v210_v29 = vmul.f32 0.00022905065, %v1446_v41 }
  0xad   :  { %v328_v24 = vadd.f32 0.11098505, %v320_v40  ;;  %1217 = vrcp.f32 %v356_v57  ;;  %v225_v16 = vmul.f32 %v217_v60, %v1414_v47  ;;  %v248_v40 = vadd.f32 0.18520832, %v240_v8 }
  0xae   :  { %v282_v2 = vadd.f32 2.3547966e-05, %v274_v55  ;;  %v351_v5 = vmul.f32 %v343_v52, %v1374_v44  ;;  %v211_v43 = vadd.f32 0.003408291, %v1428_v0 }
  0xaf   :  { %v336_v59 = vmul.f32 %v328_v24, %v1404_v31  ;;  %v256_v55 = vmul.f32 %v248_v40, %v1404_v31 }
  0xb0   :  { %v290_v11 = vmul.f32 %v282_v2, %v1446_v41 }
  0xb1   :  { %v1214_v63 = vpop.eup %1213 }
  0xb2   :  { %v373_v4 = vmul.f32 %v1214_v63, %v357_v36  ;;  %v289_v36 = vmul.f32 %v281_v21, %v1414_v47  ;;  %v1216_v42 = vpop.eup %1215  ;;  %v339_v21 = vadd.f32 0.49746925, %v331_v49  ;;  %v298_v28 = vadd.f32 0.0010179626, %v290_v11 }
  0xb3   :  { %v374_v51 = vmul.f32 %v1216_v42, %v358_v61  ;;  %v344_v61 = vadd.f32 0.49746925, %v336_v59  ;;  %v244_v49 = vadd.f32 0.18520832, %v236_v20 }
  0xb4   :  { %v381_v12 = vsub.f32 2.0, %v373_v4  ;;  %v297_v46 = vadd.f32 0.0010179626, %v289_v36  ;;  %v218_v36 = vadd.f32 0.003408291, %v210_v29  ;;  %v347_v24 = vmul.f32 %v339_v21, %v1363_v34 }
  0xb5   :  { %v382_v58 = vsub.f32 2.0, %v374_v51  ;;  %v352_v30 = vmul.f32 %v344_v61, %v1404_v31  ;;  %v252_v2 = vmul.f32 %v244_v49, %v1333_v18 }
  0xb6   :  { %v389_v32 = vmul.f32 %v1214_v63, %v381_v12  ;;  %v305_v54 = vmul.f32 %v297_v46, %v1414_v47  ;;  %v215_v63 = vadd.f32 0.003408291, %v207_v45  ;;  %v233_v46 = vadd.f32 0.050955694, %v225_v16 }
  0xb7   :  { %v390_v4 = vmul.f32 %v1216_v42, %v382_v58  ;;  %v360_v19 = vadd.f32 1.0, %v352_v30  ;;  %v306_v42 = vmul.f32 %v298_v28, %v1446_v41  ;;  %v226_v53 = vmul.f32 %v218_v36, %v1446_v41 }
  0xb8   :  { %v405_v50 = vmul.f32 %v397_v39, %v389_v32  ;;  %v313_v1 = vadd.f32 0.01407047, %v305_v54  ;;  %v223_v22 = vmul.f32 %v215_v63, %v1374_v44  ;;  %v359_v39 = vadd.f32 1.0, %v351_v5 }
  0xb9   :  { %v406_v12 = vmul.f32 %v398_v62, %v390_v4  ;;  %1219 = vrcp.f32 %v360_v19  ;;  %v314_v51 = vadd.f32 0.01407047, %v306_v42  ;;  %v241_v20 = vmul.f32 %v233_v46, %v1414_v47 }
  0xba   :  { %v413_v3 = vadd.f32 1.0, %v405_v50  ;;  %v321_v9 = vmul.f32 %v313_v1, %v1414_v47  ;;  %v231_v52 = vadd.f32 0.050955694, %v223_v22  ;;  %1221 = vrcp.f32 %v359_v39 }
  0xbb   :  { %v414_v35 = vadd.f32 1.0, %v406_v12  ;;  %v219_v58 = vmul.f32 %v211_v43, %v1363_v34  ;;  %v355_v1 = vadd.f32 1.0, %v347_v24  ;;  %v264_v4 = vadd.f32 1.1283791, %v256_v55 }
  0xbc   :  { %v329_v23 = vadd.f32 0.11098505, %v321_v9  ;;  %v1463_v32 = vmul.f32 %v413_v3, %v165_v6  ;;  %v1218_v6 = vpop.eup %1217  ;;  %v239_v31 = vmul.f32 %v231_v52, %v1374_v44  ;;  %v234_v3 = vadd.f32 0.050955694, %v226_v53 }
  0xbd   :  { %v1468_v45 = vmul.f32 %v414_v35, %v166_v25  ;;  %v322_v25 = vmul.f32 %v314_v51, %v1446_v41  ;;  %v372_v59 = vmul.f32 %v1218_v6, %v356_v57  ;;  %v249_v5 = vadd.f32 0.18520832, %v241_v20 }
  0xbe   :  { %v337_v33 = vmul.f32 %v329_v23, %v1414_v47  ;;  %v227_v9 = vadd.f32 0.050955694, %v219_v58  ;;  %v260_v30 = vadd.f32 1.1283791, %v252_v2  ;;  %v247_v16 = vadd.f32 0.18520832, %v239_v31 }
  0xbf   :  { %v1168_v54 = vpack.i.bf16 %v1463_v32, %v1468_v45  ;;  %v330_v62 = vadd.f32 0.11098505, %v322_v25  ;;  %v1220_v63 = vpop.eup %1219  ;;  %v380_v11 = vsub.f32 2.0, %v372_v59  ;;  %v242_v21 = vmul.f32 %v234_v3, %v1446_v41 }
  0xc0   :  { %v345_v50 = vadd.f32 0.49746925, %v337_v33  ;;  %v376_v61 = vmul.f32 %v1220_v63, %v360_v19  ;;  %v1222_v8 = vpop.eup %1221  ;;  %v400_v22 = vmul.f32 %v1396_v13, %v264_v4  ;;  %v257_v35 = vmul.f32 %v249_v5, %v1414_v47 }
  0xc1   :  { %1169 = vrot.lane.b32.xlu1 %v1168_v54, %s1253_s0  ;;  %v338_v29 = vmul.f32 %v330_v62, %v1446_v41  ;;  %v375_v28 = vmul.f32 %v1222_v8, %v359_v39  ;;  %v235_v36 = vmul.f32 %v227_v9, %v1363_v34  ;;  %v388_v40 = vmul.f32 %v1218_v6, %v380_v11 }
  0xc2   :  { %v353_v0 = vmul.f32 %v345_v50, %v1414_v47  ;;  %v384_v12 = vsub.f32 2.0, %v376_v61  ;;  %v255_v43 = vmul.f32 %v247_v16, %v1374_v44  ;;  %v250_v49 = vadd.f32 0.18520832, %v242_v21 }
  0xc3   :  { %v346_v57 = vadd.f32 0.49746925, %v338_v29  ;;  %v396_v50 = vmul.f32 %v1329_v17, %v260_v30  ;;  %v168_v51 = vmul.f32 0.5, %v1383_v56  ;;  %v383_v24 = vsub.f32 2.0, %v375_v28 }
  0xc4   :  { %v361_v60 = vadd.f32 1.0, %v353_v0  ;;  %v392_v18 = vmul.f32 %v1220_v63, %v384_v12  ;;  %v265_v39 = vadd.f32 1.1283791, %v257_v35  ;;  %v243_v53 = vadd.f32 0.18520832, %v235_v36 }
  0xc5   :  { %v354_v23 = vmul.f32 %v346_v57, %v1446_v41  ;;  %v404_v54 = vmul.f32 %v396_v50, %v388_v40  ;;  %v263_v6 = vadd.f32 1.1283791, %v255_v43  ;;  %v258_v44 = vmul.f32 %v250_v49, %v1446_v41 }
  0xc6   :  { %1223 = vrcp.f32 %v361_v60  ;;  %v408_v33 = vmul.f32 %v400_v22, %v392_v18  ;;  %v391_v20 = vmul.f32 %v1222_v8, %v383_v24  ;;  %v401_v56 = vmul.f32 %v1407_v38, %v265_v39 }
  0xc7   :  { %1225 = vrcp.f32 %v355_v1  ;;  %v362_v42 = vadd.f32 1.0, %v354_v23  ;;  %v251_v59 = vmul.f32 %v243_v53, %v1363_v34  ;;  %v399_v62 = vmul.f32 %v1366_v37, %v263_v6 }
  0xc8   :  { %v416_v13 = vadd.f32 1.0, %v408_v33  ;;  %v266_v2 = vadd.f32 1.1283791, %v258_v44  ;;  %v164_v41 = vmul.f32 0.5, %v1326_v15  ;;  %v169_v11 = vmul.f32 0.5, %v1391_v7 }
  0xc9   :  { %1227 = vrcp.f32 %v362_v42  ;;  %v407_v4 = vmul.f32 %v399_v62, %v391_v20  ;;  %v259_v38 = vadd.f32 1.1283791, %v251_v59  ;;  %v167_v15 = vmul.f32 0.5, %v1345_v26 }
  0xca   :  { %v1491_v55 = vmul.f32 %v416_v13, %v168_v51  ;;  %v402_v34 = vmul.f32 %v1433_v10, %v266_v2  ;;  %v170_v16 = vmul.f32 0.5, %v1416_v48  ;;  %v17_v36 = vlaneseq }
  0xcb   :  { %v415_v37 = vadd.f32 1.0, %v407_v4  ;;  %v395_v57 = vmul.f32 %v1347_v27, %v259_v38  ;;  %v163_v27 = vmul.f32 0.5, %v1324_v14 }
  0xcc   :  { %v1224_v19 = vpop.eup %1223  ;;  %v1173_v25 = vpack.i.bf16 %v1463_v32, %v1491_v55  ;;  %v1535_v40 = vand.u32 127, %v17_v36 }
  0xcd   :  { %v377_v46 = vmul.f32 %v1224_v19, %v361_v60  ;;  %v1226_v47 = vpop.eup %1225  ;;  %v412_v60 = vadd.f32 1.0, %v404_v54  ;;  %v1513_v18 = vmul.f32 %v415_v37, %v167_v15 }
  0xce   :  { %v371_v17 = vmul.f32 %v1226_v47, %v355_v1  ;;  %1174 = vrot.lane.b32.xlu2 %v1173_v25, %s1254_s1  ;;  %v1538_v14 = vadd.s32 384, %v1535_v40  ;;  %v1553_v49 = vadd.s32 128, %v1535_v40  ;;  %vm468_vm4 = vcmp.lt.s32.totalorder %v1535_v40, 127 }
  0xcf   :  { %v385_v52 = vsub.f32 2.0, %v377_v46  ;;  %v1228_v58 = vpop.eup %1227  ;;  %v1501_v61 = vmul.f32 %v412_v60, %v164_v41  ;;  %v1256_v46 = vmov 1.0   ;;  %vm443_vm5 = vcmp.lt.s32.totalorder %v1535_v40, 1 }
  0xd0   :  { %v378_v31 = vmul.f32 %v1228_v58, %v362_v42  ;;  %v379_v3 = vsub.f32 2.0, %v371_v17  ;;  %v25_v33 = vand.u32 255, %v1538_v14  ;;  %v1255_v42 = vmov 0.0   ;;  %1138 = vmatpush.msk.msrb.mxu2 %vm486_vm2, %v1256_v46  ;;  %1132 = vmatpush.msk.msrb.mxu0 %vm486_vm2, %v1256_v46 }
  0xd1   :  { %v393_v0 = vmul.f32 %v1224_v19, %v385_v52  ;;  %v1178_v8 = vpack.i.bf16 %v1501_v61, %v1468_v45  ;;  %v1193_v19 = vpack.i.bf16 %v1501_v61, %v1491_v55  ;;  %v23_v50 = vand.u32 255, %v1553_v49 }
  0xd2   :  { %v386_v1 = vsub.f32 2.0, %v378_v31  ;;  %v387_v9 = vmul.f32 %v1226_v47, %v379_v3  ;;  %vm29_vm1 = vcmp.lt.s32.totalorder %v25_v33, 196  ;;  %vm41_vm7 = vcmp.lt.s32.totalorder %v25_v33, 197 }
  0xd3   :  { %v409_v63 = vmul.f32 %v401_v56, %v393_v0  ;;  %v1544_v43 = vsel %vm29_vm1, 1.0, %v1255_v42  ;;  %vm27_vm3 = vcmp.lt.s32.totalorder %v23_v50, 196  ;;  %vm39_vm8 = vcmp.lt.s32.totalorder %v23_v50, 197 }
  0xd4   :  { %v394_v5 = vmul.f32 %v1228_v58, %v386_v1  ;;  %v403_v10 = vmul.f32 %v395_v57, %v387_v9  ;;  %1141 = vmatpush.msk.msrb.mxu3 %vm486_vm2, %v1544_v43  ;;  %v1559_v51 = vsel %vm27_vm3, 1.0, %v1255_v42 }
  0xd5   :  { %v417_v29 = vadd.f32 1.0, %v409_v63  ;;  %1135 = vmatpush.msk.msrb.mxu1 %vm486_vm2, %v1559_v51 }
  0xd6   :  { %v410_v12 = vmul.f32 %v402_v34, %v394_v5  ;;  %1179 = vrot.lane.b32.xlu2 %v1178_v8, %s1254_s1  ;;  %v411_v23 = vadd.f32 1.0, %v403_v10  ;;  %v478_v10 = vld [vmem:[%s1923_s2 + $0x8] sm:$0xff] }
  0xd7   :  { %v1510_v30 = vmul.f32 %v417_v29, %v169_v11 }
  0xd8   :  { %v418_v21 = vadd.f32 1.0, %v410_v12  ;;  %v1524_v48 = vmul.f32 %v411_v23, %v163_v27  ;;  %v477_v12 = vld [vmem:[%s1923_s2] sm:$0xff] }
  0xda   :  { %v1515_v22 = vmul.f32 %v418_v21, %v170_v16  ;;  %v1203_v28 = vpack.i.bf16 %v1524_v48, %v1513_v18  ;;  %v1188_v35 = vpack.i.bf16 %v1510_v30, %v1524_v48 }
  0xdc   :  { %v1198_v7 = vpack.i.bf16 %v1515_v22, %v1510_v30  ;;  %v1183_v26 = vpack.i.bf16 %v1515_v22, %v1513_v18 }
  0xde   :  { %1199 = vrot.lane.b32.xlu1 %v1198_v7, %s1254_s1  ;;  %1184 = vrot.lane.b32.xlu0 %v1183_v26, %s1253_s0 }
  0xe6   :  { %1204 = vrot.lane.b32.xlu1 %v1203_v28, %s1254_s1  ;;  %1189 = vrot.lane.b32.xlu0 %v1188_v35, %s1253_s0 }
  0xee   :  { %1194 = vrot.lane.b32.xlu0 %v1193_v19, %s1253_s0 }
 0x128   :  { %v1175_v24 = vpop.permute.xlu2 %1174 }
 0x129   :  { %v1177_v63 = vunpack.i.h.bf16 %v1175_v24  ;;  %v1176_v2 = vunpack.i.l.bf16 %v1175_v24 }
 0x130   :  { %v1180_v6 = vpop.permute.xlu2 %1179 }
 0x131   :  { %v1181_v59 = vunpack.i.l.bf16 %v1180_v6  ;;  %v1182_v31 = vunpack.i.h.bf16 %v1180_v6 }
 0x133   :  { %v1170_v13 = vpop.permute.xlu1 %1169  ;;  %v444_v1 = vsel %vm443_vm5, %v1177_v63, %v1181_v59  ;;  %v446_v8 = vsel %vm443_vm5, %v1182_v31, %v1177_v63 }
 0x134   :  { %v1172_v0 = vunpack.i.h.bf16 %v1170_v13  ;;  %v1171_v44 = vunpack.i.l.bf16 %v1170_v13 }
 0x136   :  { %v469_v41 = vsel %vm468_vm4, %v1172_v0, %v1171_v44 }
 0x150   :  { %v1185_v39 = vpop.permute.xlu0 %1184  ;;  %v1200_v54 = vpop.permute.xlu1 %1199 }
 0x151   :  { %v1187_v52 = vunpack.i.h.bf16 %v1185_v39  ;;  %v1186_v47 = vunpack.i.l.bf16 %v1185_v39  ;;  %v1202_v17 = vunpack.i.h.bf16 %v1200_v54  ;;  %v1201_v20 = vunpack.i.l.bf16 %v1200_v54 }
 0x153   :  { %v476_v53 = vsel %vm468_vm4, %v1187_v52, %v1186_v47  ;;  %v445_v3 = vsel %vm443_vm5, %v1201_v20, %v1202_v17  ;;  %v447_v4 = vsel %vm443_vm5, %v1176_v2, %v1201_v20 }
 0x154   :  { %578 = vmatpush.msrb.mxu3 %v476_v53 }
 0x158   :  { %v1190_v25 = vpop.permute.xlu0 %1189  ;;  %v1205_v38 = vpop.permute.xlu1 %1204 }
 0x159   :  { %v1192_v56 = vunpack.i.h.bf16 %v1190_v25  ;;  %v1191_v58 = vunpack.i.l.bf16 %v1190_v25  ;;  %v1206_v9 = vunpack.i.l.bf16 %v1205_v38  ;;  %v1207_v15 = vunpack.i.h.bf16 %v1205_v38 }
 0x15b   :  { %v470_v60 = vsel %vm468_vm4, %v1192_v56, %v1187_v52  ;;  %v475_v62 = vsel %vm468_vm4, %v1171_v44, %v1191_v58  ;;  %v451_v21 = vsel %vm443_vm5, %v1202_v17, %v1206_v9 }
 0x15c   :  { %555 = vmatpush.msrb.mxu2 %v470_v60  ;;  %579 = vmatpush.msrb.mxu3 %v475_v62 }
 0x15e   :  { %556 = vmatpush.msrb.mxu2 %v469_v41  ;;  %580 = vmatpush.msrb.mxu3 %v445_v3 }
 0x160   :  { %v1195_v29 = vpop.permute.xlu0 %1194  ;;  %557 = vmatpush.msrb.mxu2 %v447_v4  ;;  %581 = vmatpush.msrb.mxu3 %v444_v1 }
 0x161   :  { %v1197_v5 = vunpack.i.h.bf16 %v1195_v29  ;;  %v1196_v34 = vunpack.i.l.bf16 %v1195_v29 }
 0x162   :  { %558 = vmatpush.msrb.mxu2 %v446_v8  ;;  %582 = vmatpush.msrb.mxu3 %v1515_v22 }
 0x163   :  { %v474_v37 = vsel %vm468_vm4, %v1186_v47, %v1196_v34  ;;  %v472_v11 = vsel %vm468_vm4, %v1196_v34, %v1192_v56  ;;  %v473_v57 = vsel %vm468_vm4, %v1191_v58, %v1197_v5  ;;  %v471_v16 = vsel %vm468_vm4, %v1197_v5, %v1172_v0 }
 0x164   :  { %509 = vmatpush.msrb.mxu0 %v474_v37  ;;  %532 = vmatpush.msrb.mxu1 %v472_v11 }
 0x165   :  { %559 = vmatpush.msrb.mxu2 %v1510_v30  ;;  %583 = vmatpush.msrb.mxu3 %v1468_v45  ;;  %v449_v45 = vsel %vm443_vm5, %v1206_v9, %v1176_v2  ;;  %v450_v30 = vsel %vm443_vm5, %v1181_v59, %v1207_v15 }
 0x166   :  { %1142 = vmatmul.msk.f32.vlgmr.msrb.gmra.mxu3 %vm479_vm6, %v477_v12  ;;  %510 = vmatpush.msrb.mxu0 %v473_v57 }
 0x167   :  { %533 = vmatpush.msrb.mxu1 %v471_v16  ;;  %560 = vmatpush.msrb.mxu2 %v1463_v32  ;;  %v448_v32 = vsel %vm443_vm5, %v1207_v15, %v1182_v31 }
 0x168   :  { %1139 = vmatmul.msk.f32.vlgmr.msrb.gmra.mxu2 %vm479_vm6, %v477_v12  ;;  %511 = vmatpush.msrb.mxu0 %v451_v21 }
 0x169   :  { %534 = vmatpush.msrb.mxu1 %v449_v45  ;;  %1156 = vmatpush.msk.msra.mxu2 %vm486_vm2, %v1256_v46 }
 0x16a   :  { %512 = vmatpush.msrb.mxu0 %v450_v30 }
 0x16b   :  { %535 = vmatpush.msrb.mxu1 %v448_v32 }
 0x16c   :  { %513 = vmatpush.msrb.mxu0 %v1513_v18 }
 0x16d   :  { %536 = vmatpush.msrb.mxu1 %v1491_v55 }
 0x16e   :  { %1143 = vmatmul.msk.f32.gmra.mxu3 %vm479_vm6, %v478_v10  ;;  %514 = vmatpush.msrb.mxu0 %v1524_v48 }
 0x16f   :  { %537 = vmatpush.msrb.mxu1 %v1501_v61  ;;  %1133 = vmatmul.msk.f32.vlgmr.msrb.gmra.mxu0 %vm479_vm6, %v477_v12 }
 0x170   :  { %1136 = vmatmul.msk.f32.vlgmr.msrb.gmra.mxu1 %vm479_vm6, %v477_v12  ;;  %1140 = vmatmul.msk.f32.gmra.mxu2 %vm479_vm6, %v478_v10 }
 0x171   :  { %1152 = vmatpush.msk.msra.mxu0 %vm486_vm2, %v1256_v46 }
 0x177   :  { %1134 = vmatmul.msk.f32.gmra.mxu0 %vm479_vm6, %v478_v10 }
 0x178   :  { %1137 = vmatmul.msk.f32.gmra.mxu1 %vm479_vm6, %v478_v10 }
 0x1e9   :  { %v1623_v55 = vpop.f32.mrf.mxu3 }
 0x1eb   :  { %v1625_v18 = vpop.f32.mrf.mxu2 }
 0x1ec   :  { %v1627_v22 = vpop.f32.mrf.mxu0 }
 0x1ed   :  { %v1641_v35 = vpop.f32.mrf.mxu1 }
 0x1f1   :  { %v1629_v61 = vpop.f32.mrf.mxu3 }
 0x1f2   :  { %v606_v26 = vmul.f32 0.70710677, %v1629_v61 }
 0x1f3   :  { %v1631_v7 = vpop.f32.mrf.mxu2 }
 0x1f4   :  { %v605_v23 = vmul.f32 0.70710677, %v1631_v7  ;;  %v1635_v27 = vpop.f32.mrf.mxu0  ;;  %v1637_v48 = vclamps-f32 %v606_v26, 4.0 }
 0x1f5   :  { %v603_v36 = vmul.f32 0.70710677, %v1635_v27  ;;  %v1658_v56 = vpop.f32.mrf.mxu1 }
 0x1f6   :  { %v1639_v28 = vclamps-f32 %v605_v23, 4.0  ;;  %v630_v19 = vmul.f32 %v1637_v48, %v1637_v48  ;;  %v604_v2 = vmul.f32 0.70710677, %v1658_v56 }
 0x1f7   :  { %v1651_v52 = vclamps-f32 %v603_v36, 4.0 }
 0x1f8   :  { %v1648_v46 = vmul.f32 %v1639_v28, %v1639_v28  ;;  %v702_v13 = vmul.f32 -1.1791603e-07, %v630_v19  ;;  %v638_v47 = vmul.f32 0.00022905065, %v630_v19  ;;  %v1664_v29 = vclamps-f32 %v604_v2, 4.0 }
 0x1f9   :  { %v1656_v44 = vmul.f32 %v1651_v52, %v1651_v52 }
 0x1fa   :  { %v701_v24 = vmul.f32 -1.1791603e-07, %v1648_v46  ;;  %v710_v39 = vadd.f32 2.3547966e-05, %v702_v13  ;;  %v646_v25 = vadd.f32 0.003408291, %v638_v47  ;;  %v1671_v12 = vmul.f32 %v1664_v29, %v1664_v29 }
 0x1fb   :  { %v699_v60 = vmul.f32 -1.1791603e-07, %v1656_v44  ;;  %v635_v34 = vmul.f32 0.00022905065, %v1656_v44  ;;  %v637_v30 = vmul.f32 0.00022905065, %v1648_v46 }
 0x1fc   :  { %v709_v53 = vadd.f32 2.3547966e-05, %v701_v24  ;;  %v718_v54 = vmul.f32 %v710_v39, %v630_v19  ;;  %v654_v62 = vmul.f32 %v646_v25, %v630_v19  ;;  %v700_v21 = vmul.f32 -1.1791603e-07, %v1671_v12 }
 0x1fd   :  { %v707_v4 = vadd.f32 2.3547966e-05, %v699_v60  ;;  %v643_v16 = vadd.f32 0.003408291, %v635_v34  ;;  %v636_v13 = vmul.f32 0.00022905065, %v1671_v12 }
 0x1fe   :  { %v717_v6 = vmul.f32 %v709_v53, %v1648_v46  ;;  %v726_v0 = vadd.f32 0.0010179626, %v718_v54  ;;  %v662_v1 = vadd.f32 0.050955694, %v654_v62  ;;  %v708_v23 = vadd.f32 2.3547966e-05, %v700_v21 }
 0x1ff   :  { %v715_v9 = vmul.f32 %v707_v4, %v1656_v44  ;;  %v651_v24 = vmul.f32 %v643_v16, %v1656_v44  ;;  %v645_v47 = vadd.f32 0.003408291, %v637_v30  ;;  %v598_v30 = vmul.f32 0.5, %v1629_v61 }
 0x200   :  { %v725_v17 = vadd.f32 0.0010179626, %v717_v6  ;;  %v734_v20 = vmul.f32 %v726_v0, %v630_v19  ;;  %v670_v37 = vmul.f32 %v662_v1, %v630_v19  ;;  %v716_v39 = vmul.f32 %v708_v23, %v1671_v12 }
 0x201   :  { %v723_v57 = vadd.f32 0.0010179626, %v715_v9  ;;  %v653_v60 = vmul.f32 %v645_v47, %v1648_v46 }
 0x202   :  { %v733_v58 = vmul.f32 %v725_v17, %v1648_v46  ;;  %v742_v59 = vadd.f32 0.01407047, %v734_v20  ;;  %v678_v10 = vadd.f32 0.18520832, %v670_v37  ;;  %v724_v0 = vadd.f32 0.0010179626, %v716_v39 }
 0x203   :  { %v731_v32 = vmul.f32 %v723_v57, %v1656_v44  ;;  %v644_v17 = vadd.f32 0.003408291, %v636_v13  ;;  %v659_v20 = vadd.f32 0.050955694, %v651_v24 }
 0x204   :  { %v741_v63 = vadd.f32 0.01407047, %v733_v58  ;;  %v750_v31 = vmul.f32 %v742_v59, %v630_v19  ;;  %v686_v54 = vmul.f32 %v678_v10, %v630_v19  ;;  %v732_v58 = vmul.f32 %v724_v0, %v1671_v12 }
 0x205   :  { %v739_v36 = vadd.f32 0.01407047, %v731_v32  ;;  %v667_v1 = vmul.f32 %v659_v20, %v1656_v44 }
 0x206   :  { %v749_v41 = vmul.f32 %v741_v63, %v1648_v46  ;;  %v758_v3 = vadd.f32 0.11098505, %v750_v31  ;;  %v694_v63 = vadd.f32 1.1283791, %v686_v54 }
 0x207   :  { %v747_v53 = vmul.f32 %v739_v36, %v1656_v44  ;;  %v675_v16 = vadd.f32 0.18520832, %v667_v1 }
 0x208   :  { %v757_v38 = vadd.f32 0.11098505, %v749_v41  ;;  %v766_v5 = vmul.f32 %v758_v3, %v630_v19  ;;  %v740_v41 = vadd.f32 0.01407047, %v732_v58  ;;  %v830_v9 = vmul.f32 %v1637_v48, %v694_v63 }
 0x209   :  { %v755_v25 = vadd.f32 0.11098505, %v747_v53  ;;  %v683_v48 = vmul.f32 %v675_v16, %v1656_v44 }
 0x20a   :  { %v774_v8 = vadd.f32 0.49746925, %v766_v5  ;;  %v765_v11 = vmul.f32 %v757_v38, %v1648_v46  ;;  %v748_v38 = vmul.f32 %v740_v41, %v1671_v12  ;;  %v661_v5 = vadd.f32 0.050955694, %v653_v60 }
 0x20b   :  { %v763_v62 = vmul.f32 %v755_v25, %v1656_v44  ;;  %v691_v0 = vadd.f32 1.1283791, %v683_v48 }
 0x20c   :  { %v782_v15 = vmul.f32 %v774_v8, %v630_v19  ;;  %v773_v26 = vadd.f32 0.49746925, %v765_v11  ;;  %v652_v19 = vmul.f32 %v644_v17, %v1671_v12  ;;  %v756_v37 = vadd.f32 0.11098505, %v748_v38 }
 0x20d   :  { %v771_v3 = vadd.f32 0.49746925, %v763_v62 }
 0x20e   :  { %v790_v45 = vadd.f32 1.0, %v782_v15  ;;  %v781_v6 = vmul.f32 %v773_v26, %v1648_v46  ;;  %v660_v15 = vadd.f32 0.050955694, %v652_v19  ;;  %v764_v21 = vmul.f32 %v756_v37, %v1671_v12 }
 0x20f   :  { %v779_v34 = vmul.f32 %v771_v3, %v1656_v44  ;;  %v595_v3 = vmul.f32 0.5, %v1635_v27  ;;  %v597_v27 = vmul.f32 0.5, %v1631_v7 }
 0x210   :  { %1229 = vrcp.f32 %v790_v45  ;;  %v789_v31 = vadd.f32 1.0, %v781_v6  ;;  %v772_v10 = vadd.f32 0.49746925, %v764_v21  ;;  %v668_v26 = vmul.f32 %v660_v15, %v1671_v12 }
 0x211   :  { %v787_v11 = vadd.f32 1.0, %v779_v34  ;;  %v600_v21 = vmul.f32 0.70710677, %v1641_v35 }
 0x212   :  { %1231 = vrcp.f32 %v789_v31  ;;  %v780_v13 = vmul.f32 %v772_v10, %v1671_v12  ;;  %v676_v6 = vadd.f32 0.18520832, %v668_v26 }
 0x213   :  { %1233 = vrcp.f32 %v787_v11  ;;  %v1737_v10 = vclamps-f32 %v600_v21, 4.0 }
 0x214   :  { %v788_v39 = vadd.f32 1.0, %v780_v13  ;;  %v684_v20 = vmul.f32 %v676_v6, %v1671_v12 }
 0x215   :  { %v1744_v48 = vmul.f32 %v1737_v10, %v1737_v10 }
 0x216   :  { %v1230_v59 = vpop.eup %1229  ;;  %1235 = vrcp.f32 %v788_v39 }
 0x217   :  { %v806_v2 = vmul.f32 %v1230_v59, %v790_v45  ;;  %v669_v45 = vmul.f32 %v661_v5, %v1648_v46 }
 0x218   :  { %v1232_v23 = vpop.eup %1231 }
 0x219   :  { %v814_v4 = vsub.f32 2.0, %v806_v2  ;;  %v677_v24 = vadd.f32 0.18520832, %v669_v45  ;;  %v1234_v53 = vpop.eup %1233  ;;  %v805_v54 = vmul.f32 %v1232_v23, %v789_v31  ;;  %v692_v31 = vadd.f32 1.1283791, %v684_v20 }
 0x21a   :  { %v803_v61 = vmul.f32 %v1234_v53, %v787_v11 }
 0x21b   :  { %v822_v8 = vmul.f32 %v1230_v59, %v814_v4  ;;  %v685_v25 = vmul.f32 %v677_v24, %v1648_v46  ;;  %v813_v44 = vsub.f32 2.0, %v805_v54  ;;  %v827_v59 = vmul.f32 %v1651_v52, %v691_v0 }
 0x21c   :  { %v811_v17 = vsub.f32 2.0, %v803_v61  ;;  %v1236_v62 = vpop.eup %1235  ;;  %v828_v12 = vmul.f32 %v1664_v29, %v692_v31  ;;  %v602_v29 = vmul.f32 0.70710677, %v1623_v55 }
 0x21d   :  { %v838_v57 = vmul.f32 %v830_v9, %v822_v8  ;;  %v693_v60 = vadd.f32 1.1283791, %v685_v25  ;;  %v821_v2 = vmul.f32 %v1232_v23, %v813_v44  ;;  %v804_v41 = vmul.f32 %v1236_v62, %v788_v39 }
 0x21e   :  { %v819_v58 = vmul.f32 %v1234_v53, %v811_v17  ;;  %v596_v8 = vmul.f32 0.5, %v1658_v56  ;;  %v601_v56 = vmul.f32 0.70710677, %v1625_v18  ;;  %v696_v53 = vmul.f32 -1.1791603e-07, %v1744_v48 }
 0x21f   :  { %v846_v32 = vadd.f32 1.0, %v838_v57  ;;  %v829_v4 = vmul.f32 %v1639_v28, %v693_v60  ;;  %v812_v1 = vsub.f32 2.0, %v804_v41  ;;  %v1721_v57 = vclamps-f32 %v602_v29, 4.0 }
 0x220   :  { %v835_v63 = vmul.f32 %v827_v59, %v819_v58  ;;  %v1728_v16 = vclamps-f32 %v601_v56, 4.0  ;;  %v704_v61 = vadd.f32 2.3547966e-05, %v696_v53  ;;  %v632_v53 = vmul.f32 0.00022905065, %v1744_v48 }
 0x221   :  { %v854_v36 = vmul.f32 %v846_v32, %v598_v30  ;;  %v837_v38 = vmul.f32 %v829_v4, %v821_v2  ;;  %v820_v5 = vmul.f32 %v1236_v62, %v812_v1  ;;  %v1726_v7 = vmul.f32 %v1721_v57, %v1721_v57 }
 0x222   :  { %v843_v19 = vadd.f32 1.0, %v835_v63  ;;  %v1734_v30 = vmul.f32 %v1728_v16, %v1728_v16  ;;  %v599_v32 = vmul.f32 0.70710677, %v1627_v22  ;;  %v712_v20 = vmul.f32 %v704_v61, %v1744_v48 }
 0x223   :  { %v1696_v47 = vmul.f32 %v1544_v43, %v854_v36  ;;  %v836_v52 = vmul.f32 %v828_v12, %v820_v5  ;;  %v845_v34 = vadd.f32 1.0, %v837_v38  ;;  %v698_v45 = vmul.f32 -1.1791603e-07, %v1726_v7 }
 0x224   :  { %v1705_v46 = vmul.f32 %v843_v19, %v595_v3  ;;  %v697_v23 = vmul.f32 -1.1791603e-07, %v1734_v30  ;;  %v1740_v36 = vclamps-f32 %v599_v32, 4.0  ;;  %v720_v62 = vadd.f32 0.0010179626, %v712_v20 }
 0x225   :  { %869 = vrot.lane.b32.xlu0 %v1696_v47, %s1254_s1  ;;  %v844_v9 = vadd.f32 1.0, %v836_v52  ;;  %v1712_v11 = vmul.f32 %v845_v34, %v597_v27  ;;  %v706_v26 = vadd.f32 2.3547966e-05, %v698_v45  ;;  %v634_v12 = vmul.f32 0.00022905065, %v1726_v7 }
 0x226   :  { %863 = vrot.lane.b32.xlu1 %v1705_v46, %s1254_s1  ;;  %v705_v24 = vadd.f32 2.3547966e-05, %v697_v23  ;;  %v1749_v39 = vmul.f32 %v1740_v36, %v1740_v36  ;;  %v728_v41 = vmul.f32 %v720_v62, %v1744_v48  ;;  %v1115_v62 = vsel %vm41_vm7, 1.0, %v1255_v42 }
 0x227   :  { %v852_v37 = vmul.f32 %v844_v9, %v596_v8  ;;  %v714_v13 = vmul.f32 %v706_v26, %v1726_v7  ;;  %v642_v27 = vadd.f32 0.003408291, %v634_v12  ;;  %1158 = vmatpush.msk.msra.mxu3 %vm486_vm2, %v1115_v62 }
 0x228   :  { %v713_v6 = vmul.f32 %v705_v24, %v1734_v30  ;;  %v695_v0 = vmul.f32 -1.1791603e-07, %v1749_v39  ;;  %v736_v1 = vadd.f32 0.01407047, %v728_v41 }
 0x229   :  { %v1715_v28 = vmul.f32 %v1559_v51, %v852_v37  ;;  %v722_v54 = vadd.f32 0.0010179626, %v714_v13  ;;  %v633_v37 = vmul.f32 0.00022905065, %v1734_v30  ;;  %v650_v45 = vmul.f32 %v642_v27, %v1726_v7 }
 0x22a   :  { %v721_v17 = vadd.f32 0.0010179626, %v713_v6  ;;  %v703_v44 = vadd.f32 2.3547966e-05, %v695_v0  ;;  %v744_v34 = vmul.f32 %v736_v1, %v1744_v48 }
 0x22b   :  { %v1208_v15 = vpack.i.bf16 %v1712_v11, %v1715_v28  ;;  %v730_v25 = vmul.f32 %v722_v54, %v1726_v7  ;;  %v641_v32 = vadd.f32 0.003408291, %v633_v37  ;;  %v658_v54 = vadd.f32 0.050955694, %v650_v45 }
 0x22c   :  { %v729_v59 = vmul.f32 %v721_v17, %v1734_v30  ;;  %v711_v60 = vmul.f32 %v703_v44, %v1749_v39  ;;  %v752_v29 = vadd.f32 0.11098505, %v744_v34  ;;  %v631_v17 = vmul.f32 0.00022905065, %v1749_v39 }
 0x22d   :  { %1209 = vrot.lane.b32.xlu2 %v1208_v15, %s1254_s1  ;;  %v738_v58 = vadd.f32 0.01407047, %v730_v25  ;;  %v649_v6 = vmul.f32 %v641_v32, %v1734_v30  ;;  %v640_v44 = vadd.f32 0.003408291, %v632_v53  ;;  %v666_v20 = vmul.f32 %v658_v54, %v1726_v7 }
 0x22e   :  { %v737_v2 = vadd.f32 0.01407047, %v729_v59  ;;  %v719_v31 = vadd.f32 0.0010179626, %v711_v60  ;;  %v760_v23 = vmul.f32 %v752_v29, %v1744_v48 }
 0x22f   :  { %v746_v63 = vmul.f32 %v738_v58, %v1726_v7  ;;  %v657_v58 = vadd.f32 0.050955694, %v649_v6  ;;  %v648_v41 = vmul.f32 %v640_v44, %v1744_v48  ;;  %v594_v44 = vmul.f32 0.5, %v1623_v55 }
 0x230   :  { %v745_v19 = vmul.f32 %v737_v2, %v1734_v30  ;;  %v727_v4 = vmul.f32 %v719_v31, %v1749_v39  ;;  %v768_v61 = vadd.f32 0.49746925, %v760_v23  ;;  %v639_v31 = vadd.f32 0.003408291, %v631_v17 }
 0x231   :  { %v754_v3 = vadd.f32 0.11098505, %v746_v63  ;;  %v1114_v63 = vsel %vm39_vm8, 1.0, %v1255_v42  ;;  %v656_v1 = vadd.f32 0.050955694, %v648_v41  ;;  %v593_v41 = vmul.f32 0.5, %v1625_v18 }
 0x232   :  { %v753_v5 = vadd.f32 0.11098505, %v745_v19  ;;  %v735_v52 = vadd.f32 0.01407047, %v727_v4  ;;  %v776_v60 = vmul.f32 %v768_v61, %v1744_v48  ;;  %1154 = vmatpush.msk.msra.mxu1 %vm486_vm2, %v1114_v63  ;;  %v665_v19 = vmul.f32 %v657_v58, %v1734_v30 }
 0x233   :  { %v762_v38 = vmul.f32 %v754_v3, %v1726_v7  ;;  %v674_v3 = vadd.f32 0.18520832, %v666_v20  ;;  %v647_v4 = vmul.f32 %v639_v31, %v1749_v39 }
 0x234   :  { %v761_v9 = vmul.f32 %v753_v5, %v1734_v30  ;;  %v743_v15 = vmul.f32 %v735_v52, %v1749_v39  ;;  %v784_v33 = vadd.f32 1.0, %v776_v60 }
 0x235   :  { %v770_v8 = vadd.f32 0.49746925, %v762_v38  ;;  %v682_v42 = vmul.f32 %v674_v3, %v1726_v7  ;;  %v673_v38 = vadd.f32 0.18520832, %v665_v19  ;;  %v655_v34 = vadd.f32 0.050955694, %v647_v4 }
 0x236   :  { %v769_v21 = vadd.f32 0.49746925, %v761_v9  ;;  %v751_v26 = vadd.f32 0.11098505, %v743_v15 }
 0x237   :  { %v778_v56 = vmul.f32 %v770_v8, %v1726_v7  ;;  %v664_v8 = vmul.f32 %v656_v1, %v1744_v48  ;;  %v690_v9 = vadd.f32 1.1283791, %v682_v42  ;;  %v681_v27 = vmul.f32 %v673_v38, %v1734_v30 }
 0x238   :  { %v777_v24 = vmul.f32 %v769_v21, %v1734_v30  ;;  %v759_v0 = vmul.f32 %v751_v26, %v1749_v39 }
 0x239   :  { %v786_v13 = vadd.f32 1.0, %v778_v56  ;;  %v663_v56 = vmul.f32 %v655_v34, %v1749_v39  ;;  %v672_v21 = vadd.f32 0.18520832, %v664_v8  ;;  %v826_v7 = vmul.f32 %v1721_v57, %v690_v9 }
 0x23a   :  { %v785_v25 = vadd.f32 1.0, %v777_v24  ;;  %v767_v59 = vadd.f32 0.49746925, %v759_v0  ;;  %v689_v45 = vadd.f32 1.1283791, %v681_v27 }
 0x23b   :  { %1237 = vrcp.f32 %v786_v13  ;;  %v671_v24 = vadd.f32 0.18520832, %v663_v56  ;;  %v680_v53 = vmul.f32 %v672_v21, %v1744_v48 }
 0x23c   :  { %1239 = vrcp.f32 %v785_v25  ;;  %v775_v14 = vmul.f32 %v767_v59, %v1749_v39  ;;  %v825_v54 = vmul.f32 %v1728_v16, %v689_v45 }
 0x23d   :  { %1241 = vrcp.f32 %v784_v33  ;;  %v688_v17 = vadd.f32 1.1283791, %v680_v53 }
 0x23e   :  { %v783_v5 = vadd.f32 1.0, %v775_v14  ;;  %v875_v14 = vld [vmem:[%s1924_s3] sm:$0xff] }
 0x23f   :  { %v824_v16 = vmul.f32 %v1737_v10, %v688_v17 }
 0x240   :  { %1243 = vrcp.f32 %v783_v5 }
 0x241   :  { %v1238_v2 = vpop.eup %1237 }
 0x242   :  { %v802_v49 = vmul.f32 %v1238_v2, %v786_v13  ;;  %v1240_v50 = vpop.eup %1239 }
 0x243   :  { %v801_v52 = vmul.f32 %v1240_v50, %v785_v25  ;;  %v1242_v37 = vpop.eup %1241  ;;  %v679_v25 = vmul.f32 %v671_v24, %v1749_v39 }
 0x244   :  { %v810_v12 = vsub.f32 2.0, %v802_v49  ;;  %v800_v32 = vmul.f32 %v1242_v37, %v784_v33 }
 0x245   :  { %v809_v29 = vsub.f32 2.0, %v801_v52  ;;  %v687_v48 = vadd.f32 1.1283791, %v679_v25 }
 0x246   :  { %v818_v15 = vmul.f32 %v1238_v2, %v810_v12  ;;  %v1244_v26 = vpop.eup %1243  ;;  %v808_v6 = vsub.f32 2.0, %v800_v32 }
 0x247   :  { %v817_v13 = vmul.f32 %v1240_v50, %v809_v29  ;;  %v799_v30 = vmul.f32 %v1244_v26, %v783_v5  ;;  %v823_v33 = vmul.f32 %v1740_v36, %v687_v48  ;;  %v591_v36 = vmul.f32 0.5, %v1627_v22 }
 0x248   :  { %v834_v23 = vmul.f32 %v826_v7, %v818_v15  ;;  %v816_v58 = vmul.f32 %v1242_v37, %v808_v6 }
 0x249   :  { %v833_v61 = vmul.f32 %v825_v54, %v817_v13  ;;  %v807_v20 = vsub.f32 2.0, %v799_v30 }
 0x24a   :  { %v842_v0 = vadd.f32 1.0, %v834_v23  ;;  %v832_v3 = vmul.f32 %v824_v16, %v816_v58 }
 0x24b   :  { %v841_v2 = vadd.f32 1.0, %v833_v61  ;;  %v815_v55 = vmul.f32 %v1244_v26, %v807_v20 }
 0x24c   :  { %v850_v63 = vmul.f32 %v842_v0, %v594_v44  ;;  %v840_v49 = vadd.f32 1.0, %v832_v3 }
 0x24d   :  { %v849_v19 = vmul.f32 %v841_v2, %v593_v41  ;;  %v831_v18 = vmul.f32 %v823_v33, %v815_v55 }
 0x24e   :  { %v858_v10 = vmul.f32 %v1544_v43, %v850_v63 }
 0x24f   :  { %v839_v50 = vadd.f32 1.0, %v831_v18 }
 0x251   :  { %v847_v42 = vmul.f32 %v839_v50, %v591_v36 }
 0x287   :  { %v1210_v57 = vpop.permute.xlu2 %1209 }
 0x288   :  { %v1212_v59 = vunpack.i.h.bf16 %v1210_v57  ;;  %v1211_v60 = vunpack.i.l.bf16 %v1210_v57 }
 0x28a   :  { %v872_v31 = vsel %vm443_vm5, %v1211_v60, %v1212_v59 }
 0x28b   :  { %945 = vmatpush.msra.mxu2 %v872_v31 }
 0x28d   :  { %946 = vmatpush.msra.mxu2 %v1712_v11  ;;  %v592_v11 = vmul.f32 0.5, %v1641_v35 }
 0x28f   :  { %947 = vmatpush.msra.mxu2 %v849_v19  ;;  %v848_v4 = vmul.f32 %v840_v49, %v592_v11 }
 0x290   :  { %1157 = vmatmul.msk.f32.vlgmr.msra.gmra.mxu2 %vm876_vm9, %v875_v14 }
 0x291   :  { %v856_v35 = vmul.f32 %v1559_v51, %v848_v4 }
 0x297   :  { %v870_v62 = vpop.permute.xlu0 %869 }
 0x298   :  { %v871_v39 = vsel %vm443_vm5, %v1212_v59, %v870_v62  ;;  %v864_v1 = vpop.permute.xlu1 %863 }
 0x299   :  { %965 = vmatpush.msra.mxu3 %v871_v39  ;;  %v873_v43 = vsel %vm443_vm5, %v864_v1, %v1211_v60 }
 0x29a   :  { %925 = vmatpush.msra.mxu1 %v873_v43 }
 0x29b   :  { %966 = vmatpush.msra.mxu3 %v1696_v47  ;;  %v874_v47 = vsel %vm443_vm5, %v870_v62, %v864_v1 }
 0x29c   :  { %905 = vmatpush.msra.mxu0 %v874_v47  ;;  %926 = vmatpush.msra.mxu1 %v1715_v28 }
 0x29d   :  { %967 = vmatpush.msra.mxu3 %v858_v10 }
 0x29e   :  { %1159 = vmatmul.msk.f32.vlgmr.msra.gmra.mxu3 %vm876_vm9, %v875_v14  ;;  %906 = vmatpush.msra.mxu0 %v1705_v46 }
 0x29f   :  { %927 = vmatpush.msra.mxu1 %v856_v35 }
 0x2a0   :  { %907 = vmatpush.msra.mxu0 %v847_v42  ;;  %1155 = vmatmul.msk.f32.vlgmr.msra.gmra.mxu1 %vm876_vm9, %v875_v14 }
 0x2a1   :  { %1153 = vmatmul.msk.f32.vlgmr.msra.gmra.mxu0 %vm876_vm9, %v875_v14 }
 0x313   :  { %v1825_v38 = vpop.f32.mrf.mxu2 }
 0x314   :  { %v978_v22 = vmul.f32 0.70710677, %v1825_v38 }
 0x316   :  { %v1831_v12 = vclamps-f32 %v978_v22, 4.0 }
 0x318   :  { %v1837_v51 = vmul.f32 %v1831_v12, %v1831_v12 }
 0x31a   :  { %v1026_v27 = vmul.f32 -1.1791603e-07, %v1837_v51  ;;  %v994_v21 = vmul.f32 0.00022905065, %v1837_v51 }
 0x31c   :  { %v1030_v56 = vadd.f32 2.3547966e-05, %v1026_v27  ;;  %v998_v30 = vadd.f32 0.003408291, %v994_v21 }
 0x31d   :  { %v1841_v52 = vpop.f32.mrf.mxu1 }
 0x31e   :  { %v1839_v28 = vpop.f32.mrf.mxu0  ;;  %v977_v9 = vmul.f32 0.70710677, %v1841_v52  ;;  %v1034_v26 = vmul.f32 %v1030_v56, %v1837_v51  ;;  %v1002_v60 = vmul.f32 %v998_v30, %v1837_v51 }
 0x31f   :  { %v976_v8 = vmul.f32 0.70710677, %v1839_v28 }
 0x320   :  { %v1852_v15 = vclamps-f32 %v977_v9, 4.0  ;;  %v1038_v24 = vadd.f32 0.0010179626, %v1034_v26  ;;  %v1006_v14 = vadd.f32 0.050955694, %v1002_v60 }
 0x321   :  { %v1827_v40 = vpop.f32.mrf.mxu3  ;;  %v1850_v37 = vclamps-f32 %v976_v8, 4.0 }
 0x322   :  { %v979_v5 = vmul.f32 0.70710677, %v1827_v40  ;;  %v1862_v45 = vmul.f32 %v1852_v15, %v1852_v15  ;;  %v1042_v0 = vmul.f32 %v1038_v24, %v1837_v51  ;;  %v1010_v42 = vmul.f32 %v1006_v14, %v1837_v51 }
 0x323   :  { %v1858_v7 = vmul.f32 %v1850_v37, %v1850_v37 }
 0x324   :  { %v1833_v46 = vclamps-f32 %v979_v5, 4.0  ;;  %v1025_v53 = vmul.f32 -1.1791603e-07, %v1862_v45  ;;  %v993_v44 = vmul.f32 0.00022905065, %v1862_v45 }
 0x325   :  { %v1024_v23 = vmul.f32 -1.1791603e-07, %v1858_v7  ;;  %v992_v61 = vmul.f32 0.00022905065, %v1858_v7  ;;  %v1046_v20 = vadd.f32 0.01407047, %v1042_v0 }
 0x326   :  { %v1845_v34 = vmul.f32 %v1833_v46, %v1833_v46  ;;  %v1029_v25 = vadd.f32 2.3547966e-05, %v1025_v53  ;;  %v997_v39 = vadd.f32 0.003408291, %v993_v44 }
 0x327   :  { %v1028_v6 = vadd.f32 2.3547966e-05, %v1024_v23  ;;  %v1050_v2 = vmul.f32 %v1046_v20, %v1837_v51  ;;  %v996_v48 = vadd.f32 0.003408291, %v992_v61  ;;  %v1014_v23 = vadd.f32 0.18520832, %v1010_v42 }
 0x328   :  { %v1027_v29 = vmul.f32 -1.1791603e-07, %v1845_v34  ;;  %v995_v54 = vmul.f32 0.00022905065, %v1845_v34  ;;  %v1033_v58 = vmul.f32 %v1029_v25, %v1862_v45  ;;  %v1001_v4 = vmul.f32 %v997_v39, %v1862_v45 }
 0x329   :  { %v1032_v17 = vmul.f32 %v1028_v6, %v1858_v7  ;;  %v1054_v55 = vadd.f32 0.11098505, %v1050_v2  ;;  %v1000_v49 = vmul.f32 %v996_v48, %v1858_v7 }
 0x32a   :  { %v1031_v32 = vadd.f32 2.3547966e-05, %v1027_v29  ;;  %v999_v59 = vadd.f32 0.003408291, %v995_v54  ;;  %v1037_v16 = vadd.f32 0.0010179626, %v1033_v58 }
 0x32b   :  { %v1036_v62 = vadd.f32 0.0010179626, %v1032_v17  ;;  %v1058_v18 = vmul.f32 %v1054_v55, %v1837_v51  ;;  %v1004_v8 = vadd.f32 0.050955694, %v1000_v49  ;;  %v1005_v29 = vadd.f32 0.050955694, %v1001_v4 }
 0x32c   :  { %v1035_v13 = vmul.f32 %v1031_v32, %v1845_v34  ;;  %v1041_v3 = vmul.f32 %v1037_v16, %v1862_v45  ;;  %v1003_v19 = vmul.f32 %v999_v59, %v1845_v34  ;;  %v1018_v17 = vmul.f32 %v1014_v23, %v1837_v51 }
 0x32d   :  { %v1040_v31 = vmul.f32 %v1036_v62, %v1858_v7  ;;  %v1062_v47 = vadd.f32 0.49746925, %v1058_v18  ;;  %v1008_v53 = vmul.f32 %v1004_v8, %v1858_v7  ;;  %v1009_v6 = vmul.f32 %v1005_v29, %v1862_v45 }
 0x32e   :  { %v1039_v57 = vadd.f32 0.0010179626, %v1035_v13  ;;  %v1045_v11 = vadd.f32 0.01407047, %v1041_v3  ;;  %v1007_v36 = vadd.f32 0.050955694, %v1003_v19 }
 0x32f   :  { %v1044_v10 = vadd.f32 0.01407047, %v1040_v31  ;;  %v1066_v5 = vmul.f32 %v1062_v47, %v1837_v51  ;;  %v1013_v58 = vadd.f32 0.18520832, %v1009_v6  ;;  %v1022_v62 = vadd.f32 1.1283791, %v1018_v17 }
 0x330   :  { %v1043_v63 = vmul.f32 %v1039_v57, %v1845_v34  ;;  %v1049_v43 = vmul.f32 %v1045_v11, %v1862_v45  ;;  %v1011_v26 = vmul.f32 %v1007_v36, %v1845_v34  ;;  %v1012_v57 = vadd.f32 0.18520832, %v1008_v53 }
 0x331   :  { %v1048_v50 = vmul.f32 %v1044_v10, %v1858_v7  ;;  %v1070_v21 = vadd.f32 1.0, %v1066_v5  ;;  %v1017_v31 = vmul.f32 %v1013_v58, %v1862_v45  ;;  %v1090_v3 = vmul.f32 %v1831_v12, %v1022_v62 }
 0x332   :  { %v1047_v41 = vadd.f32 0.01407047, %v1043_v63  ;;  %v1053_v9 = vadd.f32 0.11098505, %v1049_v43  ;;  %v1015_v25 = vadd.f32 0.18520832, %v1011_v26  ;;  %v1016_v2 = vmul.f32 %v1012_v57, %v1858_v7 }
 0x333   :  { %v1052_v35 = vadd.f32 0.11098505, %v1048_v50  ;;  %1245 = vrcp.f32 %v1070_v21  ;;  %v974_v4 = vmul.f32 0.5, %v1825_v38  ;;  %v975_v5 = vmul.f32 0.5, %v1827_v40 }
 0x334   :  { %v1051_v33 = vmul.f32 %v1047_v41, %v1845_v34  ;;  %v1057_v32 = vmul.f32 %v1053_v9, %v1862_v45  ;;  %v1019_v60 = vmul.f32 %v1015_v25, %v1845_v34  ;;  %v1020_v14 = vadd.f32 1.1283791, %v1016_v2 }
 0x335   :  { %v1056_v27 = vmul.f32 %v1052_v35, %v1858_v7  ;;  %v972_v38 = vmul.f32 0.5, %v1839_v28 }
 0x336   :  { %v1055_v1 = vadd.f32 0.11098505, %v1051_v33  ;;  %v1061_v54 = vadd.f32 0.49746925, %v1057_v32  ;;  %v1023_v39 = vadd.f32 1.1283791, %v1019_v60  ;;  %v1088_v43 = vmul.f32 %v1850_v37, %v1020_v14 }
 0x337   :  { %v1060_v13 = vadd.f32 0.49746925, %v1056_v27  ;;  %v973_v37 = vmul.f32 0.5, %v1841_v52 }
 0x338   :  { %v1059_v22 = vmul.f32 %v1055_v1, %v1845_v34  ;;  %v1065_v61 = vmul.f32 %v1061_v54, %v1862_v45 }
 0x339   :  { %v1064_v30 = vmul.f32 %v1060_v13, %v1858_v7  ;;  %v1246_v59 = vpop.eup %1245  ;;  %v1091_v7 = vmul.f32 %v1833_v46, %v1023_v39 }
 0x33a   :  { %v1063_v56 = vadd.f32 0.49746925, %v1059_v22  ;;  %v1069_v20 = vadd.f32 1.0, %v1065_v61  ;;  %v1078_v63 = vmul.f32 %v1246_v59, %v1070_v21 }
 0x33b   :  { %v1068_v44 = vadd.f32 1.0, %v1064_v30 }
 0x33c   :  { %v1067_v24 = vmul.f32 %v1063_v56, %v1845_v34  ;;  %v1082_v16 = vsub.f32 2.0, %v1078_v63  ;;  %v1021_v34 = vadd.f32 1.1283791, %v1017_v31 }
 0x33e   :  { %v1071_v0 = vadd.f32 1.0, %v1067_v24  ;;  %v1086_v55 = vmul.f32 %v1246_v59, %v1082_v16  ;;  %v1089_v35 = vmul.f32 %v1852_v15, %v1021_v34 }
 0x340   :  { %1247 = vrcp.f32 %v1071_v0  ;;  %v1094_v18 = vmul.f32 %v1090_v3, %v1086_v55 }
 0x341   :  { %1249 = vrcp.f32 %v1068_v44 }
 0x342   :  { %1251 = vrcp.f32 %v1069_v20  ;;  %v1098_v45 = vadd.f32 1.0, %v1094_v18 }
 0x344   :  { %v1102_v12 = vmul.f32 %v1098_v45, %v974_v4 }
 0x346   :  { %v1248_v48 = vpop.eup %1247  ;;  %1106 = vst [vmem:[%s1925_s4 + $0x10] sm:$0xff] %v1102_v12 }
 0x347   :  { %v1079_v51 = vmul.f32 %v1248_v48, %v1071_v0  ;;  %v1250_v41 = vpop.eup %1249 }
 0x348   :  { %v1252_v19 = vpop.eup %1251  ;;  %v1076_v10 = vmul.f32 %v1250_v41, %v1068_v44 }
 0x349   :  { %v1083_v33 = vsub.f32 2.0, %v1079_v51  ;;  %v1077_v49 = vmul.f32 %v1252_v19, %v1069_v20 }
 0x34a   :  { %v1080_v11 = vsub.f32 2.0, %v1076_v10 }
 0x34b   :  { %v1087_v50 = vmul.f32 %v1248_v48, %v1083_v33  ;;  %v1081_v1 = vsub.f32 2.0, %v1077_v49 }
 0x34c   :  { %v1084_v47 = vmul.f32 %v1250_v41, %v1080_v11 }
 0x34d   :  { %v1095_v36 = vmul.f32 %v1091_v7, %v1087_v50  ;;  %v1085_v42 = vmul.f32 %v1252_v19, %v1081_v1 }
 0x34e   :  { %v1092_v22 = vmul.f32 %v1088_v43, %v1084_v47 }
 0x34f   :  { %v1099_v8 = vadd.f32 1.0, %v1095_v36  ;;  %v1093_v46 = vmul.f32 %v1089_v35, %v1085_v42 }
 0x350   :  { %v1096_v9 = vadd.f32 1.0, %v1092_v22 }
 0x351   :  { %v1103_v27 = vmul.f32 %v1099_v8, %v975_v5  ;;  %v1097_v29 = vadd.f32 1.0, %v1093_v46 }
 0x352   :  { %v1100_v56 = vmul.f32 %v1096_v9, %v972_v38 }
 0x353   :  { %1107 = vst [vmem:[%s1925_s4 + $0x18] sm:$0xff] %v1103_v27  ;;  %v1101_v15 = vmul.f32 %v1097_v29, %v973_v37 }
 0x354   :  { %1104 = vst [vmem:[%s1925_s4] sm:$0xff] %v1100_v56 }
 0x355   :  { %1105 = vst [vmem:[%s1925_s4 + $0x8] sm:$0xff] %v1101_v15 }

</bundles_post_ra>
